<compile_context>
chip_gen: v7x
topology: tpu7x:2x2x1
jax: 0.10.0
libtpu: 0.0.40
codegen_flags: <defaults>
</compile_context>

<pallas_src>
import functools

import jax
import jax.numpy as jnp
from jax import lax
from jax.experimental import pallas as pl
from jax.experimental.pallas import tpu as pltpu


def _round_up(x, m):
    return (x + m - 1) // m * m


def _make_conv_stats_kernel(k, s, Wps, Re):
    """Pass 1: per (n, do, kd) grid step, accumulate the k*k in-plane taps of depth-tap kd into an
    f32 scratch; on the last kd write the bf16 conv output tile and per-tile masked sum / sumsq."""
    k2 = k * k

    def kernel(x_ref, w_ref, mask_ref, y_ref, stats_ref, acc_ref):
        kd = pl.program_id(2)

        @pl.when(kd == 0)
        def _():
            acc_ref[...] = jnp.zeros_like(acc_ref)

        acc = acc_ref[...]
        for kh in range(k):
            for kw in range(k):
                ph = (kh % s) * s + (kw % s)        # static phase plane (stride folded in layout)
                off = (kh // s) * Wps + (kw // s)   # static row offset within the phase plane
                lhs = x_ref[ph, pl.ds(off, Re), :]  # (Re, Cin) bf16, contiguous rows
                wt = w_ref[kd * k2 + kh * k + kw]   # (Cin, Coutp) bf16, resident in VMEM
                acc = acc + jnp.dot(lhs, wt, preferred_element_type=jnp.float32)
        acc_ref[...] = acc

        @pl.when(kd == k - 1)
        def _():
            y_ref[...] = acc.astype(y_ref.dtype)    # bf16 pre-BN intermediate (lane-dense store)
            m = mask_ref[...]                       # (Re, 1): 1 for valid output pixels, else 0
            a = acc * m
            a2 = a * acc
            c = acc.shape[1]
            # 8-row partial reductions keep this on the VPU; the wrapper finishes the sum.
            stats_ref[0:8, :] = jnp.sum(a.reshape(Re // 8, 8, c), axis=0)
            stats_ref[8:16, :] = jnp.sum(a2.reshape(Re // 8, 8, c), axis=0)

    return kernel


def _bn_apply_kernel(y_ref, ss_ref, o_ref):
    """Pass 2: o = y * scale + shift (fused per-channel BN epilogue), in place on the bf16 buffer."""
    y = y_ref[...].astype(jnp.float32)
    o_ref[...] = (y * ss_ref[0:1, :] + ss_ref[1:2, :]).astype(o_ref.dtype)


@functools.partial(jax.jit, static_argnames=("stride", "eps"))
def conv3d_bn_pallas(x, w, b, gamma, beta, *, stride=1, eps=1e-5):
    """x: (N, Cin, D, H, W); w: (Cout, Cin, k, k, k); b/gamma/beta: (Cout,). Returns NCDHW f32."""
    N, Cin, D, H, W = x.shape
    Cout, Cin_w, k, _, _ = w.shape
    assert Cin == Cin_w
    p = (k - 1) // 2
    s = int(stride)
    Do = (D + 2 * p - k) // s + 1
    Ho = (H + 2 * p - k) // s + 1
    Wo = (W + 2 * p - k) // s + 1
    Dp, Hp, Wp = D + 2 * p, H + 2 * p, W + 2 * p
    k3 = k * k * k
    s2 = s * s

    # Stride-phase-decomposed geometry: each (h-phase, w-phase) plane is flattened to 1-D rows so
    # every in-kernel tap read is a contiguous slice (s=1 degenerates to the plain H*W plane).
    Hps = -(-Hp // s)
    Wps = -(-Wp // s)
    HoWps = Ho * Wps                      # extended output rows per (n, do); cols >= Wo are garbage
    Re = _round_up(HoWps, 8)              # sublane-aligned row count per tile
    qmax = (k - 1) // s
    L_need = Re + qmax * (Wps + 1)        # exclusive upper bound of flat rows any tap reads
    extra_h = -(-max(0, L_need - Hps * Wps) // Wps)
    Hps2 = Hps + extra_h
    Lps = Hps2 * Wps
    Coutp = _round_up(Cout, 128)          # lane-dense outputs / weights (no masked vst)

    # ---- glue (one layout pass each, all in bf16) -----------------------------------------------
    xb = jnp.transpose(x.astype(jnp.bfloat16), (0, 2, 3, 4, 1))          # NCDHW -> NDHWC, bf16 early
    xp = jnp.pad(xb, ((0, 0), (p, p),
                      (p, p + (Hps2 * s - Hp)),
                      (p, p + (Wps * s - Wp)),
                      (0, 0)))
    xp = xp.reshape(N, Dp, Hps2, s, Wps, s, Cin)
    xp = jnp.transpose(xp, (0, 1, 3, 5, 2, 4, 6))                        # phases to the front
    x_ph = xp.reshape(N, Dp, s2, Lps, Cin)

    w_flat = jnp.transpose(w, (2, 3, 4, 1, 0)).reshape(k3, Cin, Cout)
    w_flat = jnp.pad(w_flat, ((0, 0), (0, 0), (0, Coutp - Cout))).astype(jnp.bfloat16)

    j = jnp.arange(Re)
    mask = ((j < HoWps) & ((j % Wps) < Wo)).astype(jnp.float32).reshape(Re, 1)

    # Conv bias cancels exactly under training-mode batch norm: (y + b) - mean(y + b) = y - mean(y).
    del b

    kernel = _make_conv_stats_kernel(k, s, Wps, Re)

    # ---- pass 1: direct conv (tap-accumulated MXU) + per-tile partial BN stats -------------------
    y_conv, stats = pl.pallas_call(
        kernel,
        out_shape=(
            jax.ShapeDtypeStruct((N, Do, Re, Coutp), jnp.bfloat16),      # pre-BN conv output
            jax.ShapeDtypeStruct((N, Do, 16, Coutp), jnp.float32),       # rows 0-7 sum, 8-15 sumsq
        ),
        grid=(N, Do, k),                                                 # kd reduction axis last
        in_specs=[
            pl.BlockSpec((None, None, s2, Lps, Cin),
                         lambda n, d, kd: (n, d * s + kd, 0, 0, 0)),     # one padded depth slab
            pl.BlockSpec((k3, Cin, Coutp), lambda n, d, kd: (0, 0, 0)),  # weights resident (1 DMA)
            pl.BlockSpec((Re, 1), lambda n, d, kd: (0, 0)),              # valid-pixel mask, resident
        ],
        out_specs=(
            pl.BlockSpec((None, None, Re, Coutp), lambda n, d, kd: (n, d, 0, 0)),
            pl.BlockSpec((None, None, 16, Coutp), lambda n, d, kd: (n, d, 0, 0)),
        ),
        scratch_shapes=[pltpu.VMEM((Re, Coutp), jnp.float32)],           # f32 accumulator
        compiler_params=pltpu.CompilerParams(
            dimension_semantics=("parallel", "parallel", "arbitrary")),  # N/Do megacore-shardable
    )(x_ph, w_flat, mask)

    # ---- fold batch statistics into fused per-channel scale/shift (O(Cout) work) -----------------
    # TODO(synk): E[y^2]-mean^2 in f32 can cancel for very large M with large channel means; a
    # centered/Welford accumulation would tighten BN stats at scale.
    M = N * Do * Ho * Wo
    ch_sum = jnp.sum(stats[:, :, 0:8, :Cout], axis=(0, 1, 2))
    ch_sq = jnp.sum(stats[:, :, 8:16, :Cout], axis=(0, 1, 2))
    mean = ch_sum / M
    var = jnp.maximum(ch_sq / M - mean * mean, 0.0)      # biased variance (PyTorch training BN)
    scale = gamma.astype(jnp.float32) * lax.rsqrt(var + eps)
    shift = beta.astype(jnp.float32) - mean * scale
    ss = jnp.zeros((8, Coutp), jnp.float32)
    ss = ss.at[0, :Cout].set(scale).at[1, :Cout].set(shift)

    # ---- pass 2: y*scale + shift, in place on the bf16 intermediate (parallel over N, Do) --------
    y_norm = pl.pallas_call(
        _bn_apply_kernel,
        out_shape=jax.ShapeDtypeStruct((N, Do, Re, Coutp), jnp.bfloat16),
        grid=(N, Do),
        in_specs=[
            pl.BlockSpec((None, None, Re, Coutp), lambda n, d: (n, d, 0, 0)),
            pl.BlockSpec((8, Coutp), lambda n, d: (0, 0)),               # fused scale/shift, resident
        ],
        out_specs=pl.BlockSpec((None, None, Re, Coutp), lambda n, d: (n, d, 0, 0)),
        input_output_aliases={0: 0},                                     # normalize in place
        compiler_params=pltpu.CompilerParams(
            dimension_semantics=("parallel", "parallel")),
    )(y_conv, ss)

    # ---- drop extended/padded columns, back to NCDHW f32 (module semantics) ----------------------
    out = y_norm[:, :, :HoWps, :Cout].astype(jnp.float32)
    out = out.reshape(N, Do, Ho, Wps, Cout)[:, :, :, :Wo, :]
    return jnp.transpose(out, (0, 4, 1, 2, 3))


def conv3d_bn_ref(x, w, b, gamma, beta, *, stride=1, eps=1e-5):
    """Pure-JAX f32 reference (module semantics)."""
    k = w.shape[2]
    p = (k - 1) // 2
    y = lax.conv_general_dilated(
        x.astype(jnp.float32), w.astype(jnp.float32),
        window_strides=(stride, stride, stride),
        padding=[(p, p)] * 3,
        dimension_numbers=("NCDHW", "OIDHW", "NCDHW"),
        precision=lax.Precision.HIGHEST,
    )
    y = y + b.reshape(1, -1, 1, 1, 1)
    mean = jnp.mean(y, axis=(0, 2, 3, 4), keepdims=True)
    var = jnp.mean((y - mean) ** 2, axis=(0, 2, 3, 4), keepdims=True)
    y = (y - mean) / jnp.sqrt(var + eps)
    return y * gamma.reshape(1, -1, 1, 1, 1) + beta.reshape(1, -1, 1, 1, 1)


def _check(stride, spatial):
    nIn, nOut, kSize = 4, 8, 3
    N = 2
    D = H = W = spatial

    key = jax.random.PRNGKey(0)
    kx, kw, kb, kg, kbe = jax.random.split(key, 5)
    x = jax.random.normal(kx, (N, nIn, D, H, W), dtype=jnp.float32)
    w = 0.1 * jax.random.normal(kw, (nOut, nIn, kSize, kSize, kSize), dtype=jnp.float32)
    b = 0.1 * jax.random.normal(kb, (nOut,), dtype=jnp.float32)
    gamma = 1.0 + 0.1 * jax.random.normal(kg, (nOut,), dtype=jnp.float32)
    beta = 0.1 * jax.random.normal(kbe, (nOut,), dtype=jnp.float32)

    out = conv3d_bn_pallas(x, w, b, gamma, beta, stride=stride, eps=1e-5)
    out = jax.block_until_ready(out)

    ref = conv3d_bn_ref(x, w, b, gamma, beta, stride=stride, eps=1e-5)
    p = (kSize - 1) // 2
    Do = (D + 2 * p - kSize) // stride + 1
    assert out.shape == (N, nOut, Do, Do, Do), out.shape
    # bf16 MXU operands + bf16 pre-BN / normalized intermediates vs f32 reference: tolerance sized
    # for bf16 rounding (~1e-2 rms on unit-scale normalized output).
    err = float(jnp.max(jnp.abs(out - ref)))
    assert jnp.allclose(out, ref, atol=3e-2, rtol=3e-2), err


if __name__ == "__main__":
    _check(stride=1, spatial=10)   # dense path: grid (2, 10, 3), single stride phase
    _check(stride=2, spatial=9)    # strided down-sampling path via the 4-phase layout
    print("KERNEL_OK")
</pallas_src>

<mosaic_0001>
module attributes {stable_mosaic.version = 11 : i64} {
  func.func @kernel(%arg0: i32, %arg1: i32, %arg2: i32, %arg3: memref<1x1x1x156x4xbf16, #tpu.memory_space<vmem>>, %arg4: memref<27x4x128xbf16, #tpu.memory_space<vmem>>, %arg5: memref<120x1xf32, #tpu.memory_space<vmem>>, %arg6: memref<1x1x120x128xbf16, #tpu.memory_space<vmem>>, %arg7: memref<1x1x16x128xf32, #tpu.memory_space<vmem>>, %arg8: memref<120x128xf32, #tpu.memory_space<vmem>>) attributes {dimension_semantics = [#tpu.dimension_semantics<parallel>, #tpu.dimension_semantics<parallel>, #tpu.dimension_semantics<arbitrary>], iteration_bounds = array<i64: 2, 10, 3>, scalar_prefetch = 0 : i64, scratch_operands = 1 : i64, tpu.core_type = #tpu.core_type<tc>, window_params = [{transform_indices = @transform_0, window_bounds = array<i64: 1, 1, 1, 156, 4>}, {pipeline_mode = #tpu.pipeline_mode<synchronous>, transform_indices = @transform_1, window_bounds = array<i64: 27, 4, 128>}, {pipeline_mode = #tpu.pipeline_mode<synchronous>, transform_indices = @transform_2, window_bounds = array<i64: 120, 1>}, {transform_indices = @transform_3, window_bounds = array<i64: 1, 1, 120, 128>}, {transform_indices = @transform_4, window_bounds = array<i64: 1, 1, 16, 128>}]} {
    %c0_i32 = arith.constant 0 : i32
    %0 = arith.cmpi eq, %arg2, %c0_i32 : i32
    %1 = arith.extui %0 : i1 to i32
    %c0_i32_0 = arith.constant 0 : i32
    %2 = arith.cmpi ne, %1, %c0_i32_0 : i32
    scf.if %2 {
      %cst_91 = arith.constant 0.000000e+00 : f32
      %98 = vector.broadcast %cst_91 : f32 to vector<120x128xf32>
      %c0_92 = arith.constant 0 : index
      %c0_93 = arith.constant 0 : index
      %99 = vector.load %arg8[%c0_92, %c0_93] : memref<120x128xf32, #tpu.memory_space<vmem>>, vector<120x128xf32>
      tpu.vector_store %arg8[%c0_92, %c0_93], %98 {strides = array<i32>} : memref<120x128xf32, #tpu.memory_space<vmem>>, vector<120x128xf32>,
    } else {
    }
    %c0 = arith.constant 0 : index
    %c0_1 = arith.constant 0 : index
    %3 = vector.load %arg8[%c0, %c0_1] : memref<120x128xf32, #tpu.memory_space<vmem>>, vector<120x128xf32>
    %c0_2 = arith.constant 0 : index
    %c0_3 = arith.constant 0 : index
    %c0_4 = arith.constant 0 : index
    %c0_5 = arith.constant 0 : index
    %c0_6 = arith.constant 0 : index
    %4 = vector.load %arg3[%c0_2, %c0_3, %c0_4, %c0_5, %c0_6] : memref<1x1x1x156x4xbf16, #tpu.memory_space<vmem>>, vector<1x1x1x120x4xbf16>
    %5 = vector.shape_cast %4 : vector<1x1x1x120x4xbf16> to vector<120x4xbf16>
    %c9_i32 = arith.constant 9 : i32
    %6 = arith.muli %arg2, %c9_i32 : i32
    %c0_i32_7 = arith.constant 0 : i32
    %7 = arith.addi %6, %c0_i32_7 : i32
    %c0_i32_8 = arith.constant 0 : i32
    %8 = arith.addi %7, %c0_i32_8 : i32
    %9 = arith.index_cast %8 : i32 to index
    %c0_9 = arith.constant 0 : index
    %c0_10 = arith.constant 0 : index
    %10 = vector.load %arg4[%9, %c0_9, %c0_10] : memref<27x4x128xbf16, #tpu.memory_space<vmem>>, vector<1x4x128xbf16>
    %11 = vector.shape_cast %10 : vector<1x4x128xbf16> to vector<4x128xbf16>
    %cst = arith.constant dense<0.000000e+00> : vector<120x128xf32>
    %12 = tpu.matmul %5, %11, %cst {dimension_numbers = #tpu.dot_dimension_numbers<[1], [0], [0], [1], [0, 0, 1, 1], [], []>} : vector<120x4xbf16>, vector<4x128xbf16>, vector<120x128xf32> -> vector<120x128xf32>
    %13 = arith.addf %3, %12 : vector<120x128xf32>
    %c0_11 = arith.constant 0 : index
    %c0_12 = arith.constant 0 : index
    %c0_13 = arith.constant 0 : index
    %c1 = arith.constant 1 : index
    %c0_14 = arith.constant 0 : index
    %14 = vector.load %arg3[%c0_11, %c0_12, %c0_13, %c1, %c0_14] : memref<1x1x1x156x4xbf16, #tpu.memory_space<vmem>>, vector<1x1x1x120x4xbf16>
    %15 = vector.shape_cast %14 : vector<1x1x1x120x4xbf16> to vector<120x4xbf16>
    %c9_i32_15 = arith.constant 9 : i32
    %16 = arith.muli %arg2, %c9_i32_15 : i32
    %c0_i32_16 = arith.constant 0 : i32
    %17 = arith.addi %16, %c0_i32_16 : i32
    %c1_i32 = arith.constant 1 : i32
    %18 = arith.addi %17, %c1_i32 : i32
    %19 = arith.index_cast %18 : i32 to index
    %c0_17 = arith.constant 0 : index
    %c0_18 = arith.constant 0 : index
    %20 = vector.load %arg4[%19, %c0_17, %c0_18] : memref<27x4x128xbf16, #tpu.memory_space<vmem>>, vector<1x4x128xbf16>
    %21 = vector.shape_cast %20 : vector<1x4x128xbf16> to vector<4x128xbf16>
    %cst_19 = arith.constant dense<0.000000e+00> : vector<120x128xf32>
    %22 = tpu.matmul %15, %21, %cst_19 {dimension_numbers = #tpu.dot_dimension_numbers<[1], [0], [0], [1], [0, 0, 1, 1], [], []>} : vector<120x4xbf16>, vector<4x128xbf16>, vector<120x128xf32> -> vector<120x128xf32>
    %23 = arith.addf %13, %22 : vector<120x128xf32>
    %c0_20 = arith.constant 0 : index
    %c0_21 = arith.constant 0 : index
    %c0_22 = arith.constant 0 : index
    %c2 = arith.constant 2 : index
    %c0_23 = arith.constant 0 : index
    %24 = vector.load %arg3[%c0_20, %c0_21, %c0_22, %c2, %c0_23] : memref<1x1x1x156x4xbf16, #tpu.memory_space<vmem>>, vector<1x1x1x120x4xbf16>
    %25 = vector.shape_cast %24 : vector<1x1x1x120x4xbf16> to vector<120x4xbf16>
    %c9_i32_24 = arith.constant 9 : i32
    %26 = arith.muli %arg2, %c9_i32_24 : i32
    %c0_i32_25 = arith.constant 0 : i32
    %27 = arith.addi %26, %c0_i32_25 : i32
    %c2_i32 = arith.constant 2 : i32
    %28 = arith.addi %27, %c2_i32 : i32
    %29 = arith.index_cast %28 : i32 to index
    %c0_26 = arith.constant 0 : index
    %c0_27 = arith.constant 0 : index
    %30 = vector.load %arg4[%29, %c0_26, %c0_27] : memref<27x4x128xbf16, #tpu.memory_space<vmem>>, vector<1x4x128xbf16>
    %31 = vector.shape_cast %30 : vector<1x4x128xbf16> to vector<4x128xbf16>
    %cst_28 = arith.constant dense<0.000000e+00> : vector<120x128xf32>
    %32 = tpu.matmul %25, %31, %cst_28 {dimension_numbers = #tpu.dot_dimension_numbers<[1], [0], [0], [1], [0, 0, 1, 1], [], []>} : vector<120x4xbf16>, vector<4x128xbf16>, vector<120x128xf32> -> vector<120x128xf32>
    %33 = arith.addf %23, %32 : vector<120x128xf32>
    %c0_29 = arith.constant 0 : index
    %c0_30 = arith.constant 0 : index
    %c0_31 = arith.constant 0 : index
    %c12 = arith.constant 12 : index
    %c0_32 = arith.constant 0 : index
    %34 = vector.load %arg3[%c0_29, %c0_30, %c0_31, %c12, %c0_32] : memref<1x1x1x156x4xbf16, #tpu.memory_space<vmem>>, vector<1x1x1x120x4xbf16>
    %35 = vector.shape_cast %34 : vector<1x1x1x120x4xbf16> to vector<120x4xbf16>
    %c9_i32_33 = arith.constant 9 : i32
    %36 = arith.muli %arg2, %c9_i32_33 : i32
    %c3_i32 = arith.constant 3 : i32
    %37 = arith.addi %36, %c3_i32 : i32
    %c0_i32_34 = arith.constant 0 : i32
    %38 = arith.addi %37, %c0_i32_34 : i32
    %39 = arith.index_cast %38 : i32 to index
    %c0_35 = arith.constant 0 : index
    %c0_36 = arith.constant 0 : index
    %40 = vector.load %arg4[%39, %c0_35, %c0_36] : memref<27x4x128xbf16, #tpu.memory_space<vmem>>, vector<1x4x128xbf16>
    %41 = vector.shape_cast %40 : vector<1x4x128xbf16> to vector<4x128xbf16>
    %cst_37 = arith.constant dense<0.000000e+00> : vector<120x128xf32>
    %42 = tpu.matmul %35, %41, %cst_37 {dimension_numbers = #tpu.dot_dimension_numbers<[1], [0], [0], [1], [0, 0, 1, 1], [], []>} : vector<120x4xbf16>, vector<4x128xbf16>, vector<120x128xf32> -> vector<120x128xf32>
    %43 = arith.addf %33, %42 : vector<120x128xf32>
    %c0_38 = arith.constant 0 : index
    %c0_39 = arith.constant 0 : index
    %c0_40 = arith.constant 0 : index
    %c13 = arith.constant 13 : index
    %c0_41 = arith.constant 0 : index
    %44 = vector.load %arg3[%c0_38, %c0_39, %c0_40, %c13, %c0_41] : memref<1x1x1x156x4xbf16, #tpu.memory_space<vmem>>, vector<1x1x1x120x4xbf16>
    %45 = vector.shape_cast %44 : vector<1x1x1x120x4xbf16> to vector<120x4xbf16>
    %c9_i32_42 = arith.constant 9 : i32
    %46 = arith.muli %arg2, %c9_i32_42 : i32
    %c3_i32_43 = arith.constant 3 : i32
    %47 = arith.addi %46, %c3_i32_43 : i32
    %c1_i32_44 = arith.constant 1 : i32
    %48 = arith.addi %47, %c1_i32_44 : i32
    %49 = arith.index_cast %48 : i32 to index
    %c0_45 = arith.constant 0 : index
    %c0_46 = arith.constant 0 : index
    %50 = vector.load %arg4[%49, %c0_45, %c0_46] : memref<27x4x128xbf16, #tpu.memory_space<vmem>>, vector<1x4x128xbf16>
    %51 = vector.shape_cast %50 : vector<1x4x128xbf16> to vector<4x128xbf16>
    %cst_47 = arith.constant dense<0.000000e+00> : vector<120x128xf32>
    %52 = tpu.matmul %45, %51, %cst_47 {dimension_numbers = #tpu.dot_dimension_numbers<[1], [0], [0], [1], [0, 0, 1, 1], [], []>} : vector<120x4xbf16>, vector<4x128xbf16>, vector<120x128xf32> -> vector<120x128xf32>
    %53 = arith.addf %43, %52 : vector<120x128xf32>
    %c0_48 = arith.constant 0 : index
    %c0_49 = arith.constant 0 : index
    %c0_50 = arith.constant 0 : index
    %c14 = arith.constant 14 : index
    %c0_51 = arith.constant 0 : index
    %54 = vector.load %arg3[%c0_48, %c0_49, %c0_50, %c14, %c0_51] : memref<1x1x1x156x4xbf16, #tpu.memory_space<vmem>>, vector<1x1x1x120x4xbf16>
    %55 = vector.shape_cast %54 : vector<1x1x1x120x4xbf16> to vector<120x4xbf16>
    %c9_i32_52 = arith.constant 9 : i32
    %56 = arith.muli %arg2, %c9_i32_52 : i32
    %c3_i32_53 = arith.constant 3 : i32
    %57 = arith.addi %56, %c3_i32_53 : i32
    %c2_i32_54 = arith.constant 2 : i32
    %58 = arith.addi %57, %c2_i32_54 : i32
    %59 = arith.index_cast %58 : i32 to index
    %c0_55 = arith.constant 0 : index
    %c0_56 = arith.constant 0 : index
    %60 = vector.load %arg4[%59, %c0_55, %c0_56] : memref<27x4x128xbf16, #tpu.memory_space<vmem>>, vector<1x4x128xbf16>
    %61 = vector.shape_cast %60 : vector<1x4x128xbf16> to vector<4x128xbf16>
    %cst_57 = arith.constant dense<0.000000e+00> : vector<120x128xf32>
    %62 = tpu.matmul %55, %61, %cst_57 {dimension_numbers = #tpu.dot_dimension_numbers<[1], [0], [0], [1], [0, 0, 1, 1], [], []>} : vector<120x4xbf16>, vector<4x128xbf16>, vector<120x128xf32> -> vector<120x128xf32>
    %63 = arith.addf %53, %62 : vector<120x128xf32>
    %c0_58 = arith.constant 0 : index
    %c0_59 = arith.constant 0 : index
    %c0_60 = arith.constant 0 : index
    %c24 = arith.constant 24 : index
    %c0_61 = arith.constant 0 : index
    %64 = vector.load %arg3[%c0_58, %c0_59, %c0_60, %c24, %c0_61] : memref<1x1x1x156x4xbf16, #tpu.memory_space<vmem>>, vector<1x1x1x120x4xbf16>
    %65 = vector.shape_cast %64 : vector<1x1x1x120x4xbf16> to vector<120x4xbf16>
    %c9_i32_62 = arith.constant 9 : i32
    %66 = arith.muli %arg2, %c9_i32_62 : i32
    %c6_i32 = arith.constant 6 : i32
    %67 = arith.addi %66, %c6_i32 : i32
    %c0_i32_63 = arith.constant 0 : i32
    %68 = arith.addi %67, %c0_i32_63 : i32
    %69 = arith.index_cast %68 : i32 to index
    %c0_64 = arith.constant 0 : index
    %c0_65 = arith.constant 0 : index
    %70 = vector.load %arg4[%69, %c0_64, %c0_65] : memref<27x4x128xbf16, #tpu.memory_space<vmem>>, vector<1x4x128xbf16>
    %71 = vector.shape_cast %70 : vector<1x4x128xbf16> to vector<4x128xbf16>
    %cst_66 = arith.constant dense<0.000000e+00> : vector<120x128xf32>
    %72 = tpu.matmul %65, %71, %cst_66 {dimension_numbers = #tpu.dot_dimension_numbers<[1], [0], [0], [1], [0, 0, 1, 1], [], []>} : vector<120x4xbf16>, vector<4x128xbf16>, vector<120x128xf32> -> vector<120x128xf32>
    %73 = arith.addf %63, %72 : vector<120x128xf32>
    %c0_67 = arith.constant 0 : index
    %c0_68 = arith.constant 0 : index
    %c0_69 = arith.constant 0 : index
    %c25 = arith.constant 25 : index
    %c0_70 = arith.constant 0 : index
    %74 = vector.load %arg3[%c0_67, %c0_68, %c0_69, %c25, %c0_70] : memref<1x1x1x156x4xbf16, #tpu.memory_space<vmem>>, vector<1x1x1x120x4xbf16>
    %75 = vector.shape_cast %74 : vector<1x1x1x120x4xbf16> to vector<120x4xbf16>
    %c9_i32_71 = arith.constant 9 : i32
    %76 = arith.muli %arg2, %c9_i32_71 : i32
    %c6_i32_72 = arith.constant 6 : i32
    %77 = arith.addi %76, %c6_i32_72 : i32
    %c1_i32_73 = arith.constant 1 : i32
    %78 = arith.addi %77, %c1_i32_73 : i32
    %79 = arith.index_cast %78 : i32 to index
    %c0_74 = arith.constant 0 : index
    %c0_75 = arith.constant 0 : index
    %80 = vector.load %arg4[%79, %c0_74, %c0_75] : memref<27x4x128xbf16, #tpu.memory_space<vmem>>, vector<1x4x128xbf16>
    %81 = vector.shape_cast %80 : vector<1x4x128xbf16> to vector<4x128xbf16>
    %cst_76 = arith.constant dense<0.000000e+00> : vector<120x128xf32>
    %82 = tpu.matmul %75, %81, %cst_76 {dimension_numbers = #tpu.dot_dimension_numbers<[1], [0], [0], [1], [0, 0, 1, 1], [], []>} : vector<120x4xbf16>, vector<4x128xbf16>, vector<120x128xf32> -> vector<120x128xf32>
    %83 = arith.addf %73, %82 : vector<120x128xf32>
    %c0_77 = arith.constant 0 : index
    %c0_78 = arith.constant 0 : index
    %c0_79 = arith.constant 0 : index
    %c26 = arith.constant 26 : index
    %c0_80 = arith.constant 0 : index
    %84 = vector.load %arg3[%c0_77, %c0_78, %c0_79, %c26, %c0_80] : memref<1x1x1x156x4xbf16, #tpu.memory_space<vmem>>, vector<1x1x1x120x4xbf16>
    %85 = vector.shape_cast %84 : vector<1x1x1x120x4xbf16> to vector<120x4xbf16>
    %c9_i32_81 = arith.constant 9 : i32
    %86 = arith.muli %arg2, %c9_i32_81 : i32
    %c6_i32_82 = arith.constant 6 : i32
    %87 = arith.addi %86, %c6_i32_82 : i32
    %c2_i32_83 = arith.constant 2 : i32
    %88 = arith.addi %87, %c2_i32_83 : i32
    %89 = arith.index_cast %88 : i32 to index
    %c0_84 = arith.constant 0 : index
    %c0_85 = arith.constant 0 : index
    %90 = vector.load %arg4[%89, %c0_84, %c0_85] : memref<27x4x128xbf16, #tpu.memory_space<vmem>>, vector<1x4x128xbf16>
    %91 = vector.shape_cast %90 : vector<1x4x128xbf16> to vector<4x128xbf16>
    %cst_86 = arith.constant dense<0.000000e+00> : vector<120x128xf32>
    %92 = tpu.matmul %85, %91, %cst_86 {dimension_numbers = #tpu.dot_dimension_numbers<[1], [0], [0], [1], [0, 0, 1, 1], [], []>} : vector<120x4xbf16>, vector<4x128xbf16>, vector<120x128xf32> -> vector<120x128xf32>
    %93 = arith.addf %83, %92 : vector<120x128xf32>
    %c0_87 = arith.constant 0 : index
    %c0_88 = arith.constant 0 : index
    %94 = vector.load %arg8[%c0_87, %c0_88] : memref<120x128xf32, #tpu.memory_space<vmem>>, vector<120x128xf32>
    tpu.vector_store %arg8[%c0_87, %c0_88], %93 {strides = array<i32>} : memref<120x128xf32, #tpu.memory_space<vmem>>, vector<120x128xf32>,
    %c2_i32_89 = arith.constant 2 : i32
    %95 = arith.cmpi eq, %arg2, %c2_i32_89 : i32
    %96 = arith.extui %95 : i1 to i32
    %c0_i32_90 = arith.constant 0 : i32
    %97 = arith.cmpi ne, %96, %c0_i32_90 : i32
    scf.if %97 {
      %98 = arith.truncf %93 : vector<120x128xf32> to vector<120x128xbf16>
      %c0_91 = arith.constant 0 : index
      %c0_92 = arith.constant 0 : index
      %c0_93 = arith.constant 0 : index
      %c0_94 = arith.constant 0 : index
      %99 = vector.load %arg6[%c0_91, %c0_92, %c0_93, %c0_94] : memref<1x1x120x128xbf16, #tpu.memory_space<vmem>>, vector<1x1x120x128xbf16>
      %100 = vector.shape_cast %99 : vector<1x1x120x128xbf16> to vector<120x128xbf16>
      %101 = vector.shape_cast %98 : vector<120x128xbf16> to vector<1x1x120x128xbf16>
      tpu.vector_store %arg6[%c0_91, %c0_92, %c0_93, %c0_94], %101 {strides = array<i32>} : memref<1x1x120x128xbf16, #tpu.memory_space<vmem>>, vector<1x1x120x128xbf16>,
      %c0_95 = arith.constant 0 : index
      %c0_96 = arith.constant 0 : index
      %102 = vector.load %arg5[%c0_95, %c0_96] : memref<120x1xf32, #tpu.memory_space<vmem>>, vector<120x1xf32>
      %103 = vector.broadcast %102 : vector<120x1xf32> to vector<120x128xf32>
      %104 = arith.mulf %93, %103 : vector<120x128xf32>
      %105 = arith.mulf %104, %93 : vector<120x128xf32>
      %106 = vector.shape_cast %104 : vector<120x128xf32> to vector<15x8x128xf32>
      %cst_97 = arith.constant dense<0.000000e+00> : vector<8x128xf32>
      %107 = vector.multi_reduction <add>, %106, %cst_97 [0] : vector<15x8x128xf32> to vector<8x128xf32>
      %c0_98 = arith.constant 0 : index
      %c0_99 = arith.constant 0 : index
      %c0_100 = arith.constant 0 : index
      %c0_101 = arith.constant 0 : index
      %108 = vector.load %arg7[%c0_98, %c0_99, %c0_100, %c0_101] : memref<1x1x16x128xf32, #tpu.memory_space<vmem>>, vector<1x1x8x128xf32>
      %109 = vector.shape_cast %108 : vector<1x1x8x128xf32> to vector<8x128xf32>
      %110 = vector.shape_cast %107 : vector<8x128xf32> to vector<1x1x8x128xf32>
      tpu.vector_store %arg7[%c0_98, %c0_99, %c0_100, %c0_101], %110 {strides = array<i32>} : memref<1x1x16x128xf32, #tpu.memory_space<vmem>>, vector<1x1x8x128xf32>,
      %111 = vector.shape_cast %105 : vector<120x128xf32> to vector<15x8x128xf32>
      %cst_102 = arith.constant dense<0.000000e+00> : vector<8x128xf32>
      %112 = vector.multi_reduction <add>, %111, %cst_102 [0] : vector<15x8x128xf32> to vector<8x128xf32>
      %c0_103 = arith.constant 0 : index
      %c0_104 = arith.constant 0 : index
      %c8 = arith.constant 8 : index
      %c0_105 = arith.constant 0 : index
      %113 = vector.load %arg7[%c0_103, %c0_104, %c8, %c0_105] : memref<1x1x16x128xf32, #tpu.memory_space<vmem>>, vector<1x1x8x128xf32>
      %114 = vector.shape_cast %113 : vector<1x1x8x128xf32> to vector<8x128xf32>
      %115 = vector.shape_cast %112 : vector<8x128xf32> to vector<1x1x8x128xf32>
      tpu.vector_store %arg7[%c0_103, %c0_104, %c8, %c0_105], %115 {strides = array<i32>} : memref<1x1x16x128xf32, #tpu.memory_space<vmem>>, vector<1x1x8x128xf32>,
    } else {
    }
    return
  }
  func.func @transform_0(%arg0: i32, %arg1: i32, %arg2: i32) -> (i32, i32, i32, i32, i32) {
    %c1_i32 = arith.constant 1 : i32
    %0 = arith.muli %arg1, %c1_i32 : i32
    %1 = arith.addi %0, %arg2 : i32
    %c0_i32 = arith.constant 0 : i32
    %c0_i32_0 = arith.constant 0 : i32
    %c0_i32_1 = arith.constant 0 : i32
    %c0_i32_2 = arith.constant 0 : i32
    return %arg0, %1, %c0_i32, %c0_i32_0, %c0_i32_1 : i32, i32, i32, i32, i32
  }
  func.func @transform_1(%arg0: i32, %arg1: i32, %arg2: i32) -> (i32, i32, i32) {
    %c0_i32 = arith.constant 0 : i32
    %c0_i32_0 = arith.constant 0 : i32
    %c0_i32_1 = arith.constant 0 : i32
    %c0_i32_2 = arith.constant 0 : i32
    return %c0_i32, %c0_i32_0, %c0_i32_1 : i32, i32, i32
  }
  func.func @transform_2(%arg0: i32, %arg1: i32, %arg2: i32) -> (i32, i32) {
    %c0_i32 = arith.constant 0 : i32
    %c0_i32_0 = arith.constant 0 : i32
    %c0_i32_1 = arith.constant 0 : i32
    return %c0_i32, %c0_i32_0 : i32, i32
  }
  func.func @transform_3(%arg0: i32, %arg1: i32, %arg2: i32) -> (i32, i32, i32, i32) {
    %c0_i32 = arith.constant 0 : i32
    %c0_i32_0 = arith.constant 0 : i32
    %c0_i32_1 = arith.constant 0 : i32
    return %arg0, %arg1, %c0_i32, %c0_i32_0 : i32, i32, i32, i32
  }
  func.func @transform_4(%arg0: i32, %arg1: i32, %arg2: i32) -> (i32, i32, i32, i32) {
    %c0_i32 = arith.constant 0 : i32
    %c0_i32_0 = arith.constant 0 : i32
    %c0_i32_1 = arith.constant 0 : i32
    return %arg0, %arg1, %c0_i32, %c0_i32_0 : i32, i32, i32, i32
  }
}

module attributes {stable_mosaic.version = 11 : i64} {
  func.func @_bn_apply_kernel(%arg0: i32, %arg1: i32, %arg2: memref<1x1x120x128xbf16, #tpu.memory_space<vmem>>, %arg3: memref<8x128xf32, #tpu.memory_space<vmem>>, %arg4: memref<1x1x120x128xbf16, #tpu.memory_space<vmem>>) attributes {dimension_semantics = [#tpu.dimension_semantics<parallel>, #tpu.dimension_semantics<parallel>], iteration_bounds = array<i64: 2, 10>, scalar_prefetch = 0 : i64, scratch_operands = 0 : i64, tpu.core_type = #tpu.core_type<tc>, window_params = [{transform_indices = @transform_0, window_bounds = array<i64: 1, 1, 120, 128>}, {pipeline_mode = #tpu.pipeline_mode<synchronous>, transform_indices = @transform_1, window_bounds = array<i64: 8, 128>}, {transform_indices = @transform_2, window_bounds = array<i64: 1, 1, 120, 128>}]} {
    %c0 = arith.constant 0 : index
    %c0_0 = arith.constant 0 : index
    %c0_1 = arith.constant 0 : index
    %c0_2 = arith.constant 0 : index
    %0 = vector.load %arg2[%c0, %c0_0, %c0_1, %c0_2] : memref<1x1x120x128xbf16, #tpu.memory_space<vmem>>, vector<1x1x120x128xbf16>
    %1 = vector.shape_cast %0 : vector<1x1x120x128xbf16> to vector<120x128xbf16>
    %2 = arith.extf %1 : vector<120x128xbf16> to vector<120x128xf32>
    %c0_3 = arith.constant 0 : index
    %c0_4 = arith.constant 0 : index
    %3 = vector.load %arg3[%c0_3, %c0_4] : memref<8x128xf32, #tpu.memory_space<vmem>>, vector<1x128xf32>
    %4 = vector.broadcast %3 : vector<1x128xf32> to vector<120x128xf32>
    %5 = arith.mulf %2, %4 : vector<120x128xf32>
    %c1 = arith.constant 1 : index
    %c0_5 = arith.constant 0 : index
    %6 = vector.load %arg3[%c1, %c0_5] : memref<8x128xf32, #tpu.memory_space<vmem>>, vector<1x128xf32>
    %7 = vector.broadcast %6 : vector<1x128xf32> to vector<120x128xf32>
    %8 = arith.addf %5, %7 : vector<120x128xf32>
    %9 = arith.truncf %8 : vector<120x128xf32> to vector<120x128xbf16>
    %c0_6 = arith.constant 0 : index
    %c0_7 = arith.constant 0 : index
    %c0_8 = arith.constant 0 : index
    %c0_9 = arith.constant 0 : index
    %10 = vector.load %arg4[%c0_6, %c0_7, %c0_8, %c0_9] : memref<1x1x120x128xbf16, #tpu.memory_space<vmem>>, vector<1x1x120x128xbf16>
    %11 = vector.shape_cast %10 : vector<1x1x120x128xbf16> to vector<120x128xbf16>
    %12 = vector.shape_cast %9 : vector<120x128xbf16> to vector<1x1x120x128xbf16>
    tpu.vector_store %arg4[%c0_6, %c0_7, %c0_8, %c0_9], %12 {strides = array<i32>} : memref<1x1x120x128xbf16, #tpu.memory_space<vmem>>, vector<1x1x120x128xbf16>,
    return
  }
  func.func @transform_0(%arg0: i32, %arg1: i32) -> (i32, i32, i32, i32) {
    %c0_i32 = arith.constant 0 : i32
    %c0_i32_0 = arith.constant 0 : i32
    %c0_i32_1 = arith.constant 0 : i32
    return %arg0, %arg1, %c0_i32, %c0_i32_0 : i32, i32, i32, i32
  }
  func.func @transform_1(%arg0: i32, %arg1: i32) -> (i32, i32) {
    %c0_i32 = arith.constant 0 : i32
    %c0_i32_0 = arith.constant 0 : i32
    %c0_i32_1 = arith.constant 0 : i32
    return %c0_i32, %c0_i32_0 : i32, i32
  }
  func.func @transform_2(%arg0: i32, %arg1: i32) -> (i32, i32, i32, i32) {
    %c0_i32 = arith.constant 0 : i32
    %c0_i32_0 = arith.constant 0 : i32
    %c0_i32_1 = arith.constant 0 : i32
    return %arg0, %arg1, %c0_i32, %c0_i32_0 : i32, i32, i32, i32
  }
}

</mosaic_0001>

<bundles_post_ra>
// kernel: conv3d_bn_pallas.2
= control target key start
LH: loop header
LB: loop body
LE: loop exit
PB: predicated region body
PF: predicated region fallthrough
CT: control target
= control target key end

     0   :  { %s3378_s15 = smov 0   ;;  %s3380_s16 = smov 0   ;;  %s3995_s0 = inlined_call_operand.vmem [shape: bf16[2,12,1,156,4], index: 0, kind: input, shape index: {}]   ;;  %s3996_s1 = inlined_call_operand.vmem [shape: bf16[27,4,128], index: 1, kind: input, shape index: {}]   ;;  %s3997_s2 = inlined_call_operand.vmem [shape: f32[120,1], index: 2, kind: input, shape index: {}]   ;;  %s3998_s3 = inlined_call_operand.vmem [shape: bf16[2,10,120,128], index: 3, kind: output, shape index: {0}]   ;;  %s3999_s4 = inlined_call_operand.vmem [shape: f32[2,10,16,128], index: 4, kind: output, shape index: {1}]  }
   0x1   :  { %s3382_s17 = smov 0   ;;  %s3384_s18 = smov 0  }
   0x2   :  { %s3386_s19 = smov 0   ;;  %s3388_s20 = smov 0  }
   0x3   :  { %s3390_s21 = smov 0  }
   0x4 LB: > { %s27_s22 = sadd.s32 1, %s3337_s18  ;;  %s30_s23 = sadd.s32 1, %s3341_s19  ;;  %s3349_s21 = sphi %s3390_s21, %s15_s21   ;;  %s3345_s20 = sphi %s3388_s20, %s4009_s20   ;;  %s3341_s19 = sphi %s3386_s19, %s4008_s19   ;;  %s3337_s18 = sphi %s3384_s18, %s4007_s18   ;;  %s3333_s17 = sphi %s3382_s17, %s4006_s17   ;;  %s3329_s16 = sphi %s3380_s16, %s4005_s16   ;;  %s3325_s15 = sphi %s3378_s15, %s4004_s15  }
   0x5   : > { %p28_p0 = scmp.ge.s32.totalorder %s27_s22, 3  ;;  %p2575_p1 = scmp.ge.s32.totalorder %s3349_s21, 1 }
   0x6   : > { %p198_p2 = scmp.lt.s32.totalorder %s3349_s21, 61  ;;  %s34_s24 = sadd.s32 1, %s3345_s20 }
   0x7   : > { %s4011_s22 = smov (%p28_p0, %s27_s22), 0  ;;  %s4013_s23 = smov (!%p28_p0, %s30_s23), %s3341_s19 }
   0x8   : > { %p199_p3 = pnand %p2575_p1, %p198_p2  ;;  %p32_p4 = scmp.ge.s32.totalorder %s4013_s23, 10 }
   0x9   : > { %s242_s25 = sadd.s32 (!%p199_p3), %s3325_s15, %s3329_s16  ;;  %p243_p6 = scmp.lt.s32.totalorder (!%p199_p3), %s3333_s17, 1 }
   0xa   : > { %s4015_s23 = smov (%p32_p4, %s4013_s23), 0  ;;  %s4017_s24 = smov (!%p32_p4, %s34_s24), %s3345_s20 }
   0xb   : > { %4000 = sst [smem:[#allocation3_spill]] %s4015_s23  ;;  %p36_p5 = scmp.ge.s32.totalorder %s4017_s24, 2 }
   0xc   : > { %202 = sbr.rel (%p199_p3) target bundleno = 541 (0x21d), region = 32  ;;  %p245_p7 = scmp.lt.s32.totalorder (!%p199_p3), %s242_s25, 11 }
   0xd   : > { %s4019_s24 = smov (%p36_p5, %s4017_s24), 0  ;;  %p255_p8 = scmp.lt.s32.totalorder (!%p199_p3), %s3329_s16, 9 }
   0xe   : > { %4001 = sst [smem:[#allocation4_spill]] %s4019_s24  ;;  %p2580_p9 = scmp.ne.s32.totalorder (!%p199_p3), %s3325_s15, 0 }
  0x13   : > { %s4021_s17 = smov (!%p243_p6, %s3333_s17), 1  ;;  %s4023_s25 = smov (!%p245_p7, %s242_s25), 11 }
  0x14   : > { %s3187_s26 = smul.u32 240, %s4021_s17  ;;  %s4025_s16 = smov (!%p255_p8, %s3329_s16), 9  ;;  %v3351_v0 = vmov (!%p2580_p9), 0.0  }
  0x15   : > { %s3186_s27 = smul.u32 20, %s4023_s25  ;;  %s2578_s9 = sshll.u32 %s4025_s16, 1  ;;  %276 = vst [vmem:[#allocation2] sm:$0xff] (!%p2580_p9), %v3351_v0  ;;  %277 = vst [vmem:[#allocation2 + $0x8] sm:$0xff] (!%p2580_p9), %v3351_v0 }
  0x16   : > { %s3189_s29 = smul.u32 150, %s4021_s17  ;;  %278 = vst [vmem:[#allocation2 + $0x10] sm:$0xff] (!%p2580_p9), %v3351_v0  ;;  %279 = vst [vmem:[#allocation2 + $0x18] sm:$0xff] (!%p2580_p9), %v3351_v0 }
  0x17   : > { %s249_s28 = sadd.s32 %s3187_s26, %s3186_s27  ;;  %s3188_s5 = smul.u32 15, %s4025_s16  ;;  %280 = vst [vmem:[#allocation2 + $0x20] sm:$0xff] (!%p2580_p9), %v3351_v0  ;;  %281 = vst [vmem:[#allocation2 + $0x28] sm:$0xff] (!%p2580_p9), %v3351_v0 }
  0x18   : > { %s2576_s30 = sshll.u32 %s249_s28, 2  ;;  %s3190_s11 = smul.u32 20, %s4021_s17  ;;  %282 = vst [vmem:[#allocation2 + $0x30] sm:$0xff] (!%p2580_p9), %v3351_v0  ;;  %283 = vst [vmem:[#allocation2 + $0x38] sm:$0xff] (!%p2580_p9), %v3351_v0 }
  0x19   : > { %s3426_s8 = scalar_lea.vmem %s3995_s0, %s2576_s30  ;;  %s259_s10 = sadd.s32 %s3189_s29, %s3188_s5  ;;  %284 = vst [vmem:[#allocation2 + $0x40] sm:$0xff] (!%p2580_p9), %v3351_v0  ;;  %285 = vst [vmem:[#allocation2 + $0x48] sm:$0xff] (!%p2580_p9), %v3351_v0 }
  0x1a   : > { %s2577_s12 = sshll.u32 %s259_s10, 2  ;;  %s268_s25 = sadd.s32 %s3190_s11, %s2578_s9  ;;  %286 = vst [vmem:[#allocation2 + $0x50] sm:$0xff] (!%p2580_p9), %v3351_v0  ;;  %287 = vst [vmem:[#allocation2 + $0x58] sm:$0xff] (!%p2580_p9), %v3351_v0 }
  0x1b   : > { %s3431_s24 = scalar_lea.vmem %s3998_s3, %s2577_s12  ;;  %s2579_s23 = sshll.u32 %s268_s25, 3  ;;  %288 = vst [vmem:[#allocation2 + $0x60] sm:$0xff] (!%p2580_p9), %v3351_v0  ;;  %289 = vst [vmem:[#allocation2 + $0x68] sm:$0xff] (!%p2580_p9), %v3351_v0 }
  0x1c   : > { %s3436_s28 = scalar_lea.vmem %s3999_s4, %s2579_s23  ;;  %275 = sbr.rel (%p2580_p9) target bundleno = 35 (0x23), region = 36  ;;  %290 = vst [vmem:[#allocation2 + $0x70] sm:$0xff] (!%p2580_p9), %v3351_v0 }
  0x23 PF: > { %s2732_s16 = smul.u32 18, %s3325_s15  ;;  %vm388_vm0 = vcmask 1041408   ;;  %v3249_v1 = vld [vmem:[%s3426_s8] sm:$0xff]   ;;  %vm363_vm1 = vcmask 31744   ;;  %v3250_v2 = vld [vmem:[%s3426_s8 + $0x8] sm:$0xff]   ;;  %v3481_v20 = vld [vmem:[%s3426_s8 + $0x14] sm:$0xff]  }
  0x24   : > { %v927_v3 = vld [vmem:[%s3426_s8 + $0x4] sm:$0xc]  ;;  %v3449_v4 = vld [vmem:[%s3426_s8 + $0x8] sm:$0xf]  ;;  %2872 = vmatprep.mubr.msk.bf16.mxu1 %vm363_vm1, %v3249_v1  ;;  %v3470_v12 = vld [vmem:[%s3426_s8 + $0xc] sm:$0xff]   ;;  %v1168_v24 = vshrl.u32 %v3481_v20, 16 }
  0x25   : > { %s3444_s29 = scalar_lea.vmem %s3996_s1, %s2732_s16  ;;  %v3458_v8 = vcombine.low %v927_v3, %v3449_v4  ;;  %vm1149_vm2 = vsmask.f32 5376  ;;  %v1159_v15 = vshrl.u32 %v3470_v12, 16  ;;  %v1162_v16 = vshll.u32 %v3470_v12, 16  ;;  %v3254_v26 = vld [vmem:[%s3426_s8 + $0x10] sm:$0xff]   ;;  %v3255_v28 = vld [vmem:[%s3426_s8 + $0x18] sm:$0xff]  }
  0x26   : > { %v324_v5 = vld [vmem:[%s3444_s29] sm:$0x3]  ;;  %v3453_v6 = vld [vmem:[%s3444_s29 + $0x8] sm:$0x3]  ;;  %v2599_v7 = vld [vmem:[%s3444_s29 + $0x2] sm:$0x3] }
  0x27   : > { %3176 = vmatprep.subr.msk.bf16.mxu1 %vm388_vm0, %v324_v5  ;;  %v390_v9 = vsel %vm388_vm0, %v324_v5, 0  ;;  %3180 = vmatprep.subr.msk.bf16.mxu0 %vm388_vm0, %v3453_v6  ;;  %v3466_v10 = vsel %vm388_vm0, %v3453_v6, 0  ;;  %v652_v11 = vsel %vm388_vm0, %v2599_v7, 0  ;;  %v1151_v13 = vshrl.u32 %v3458_v8, 16  ;;  %v2657_v17 = vld [vmem:[%s3444_s29 + $0xa] sm:$0x3] }
  0x28   : > { %2871 = vmatpush3.bf16.msra.mxu1 %v390_v9  ;;  %2943 = vmatpush3.bf16.msra.mxu0 %v3466_v10  ;;  %v1154_v14 = vshll.u32 %v3458_v8, 16  ;;  %v1161_v21 = vrot.slane %v1159_v15, 2  ;;  %v1164_v22 = vrot.slane %v1162_v16, 3  ;;  %v1171_v25 = vshll.u32 %v3481_v20, 16  ;;  %v3490_v31 = vld [vmem:[%s3426_s8 + $0x1c] sm:$0xff]   ;;  %v3493_v32 = vld [vmem:[%s3426_s8 + $0x24] sm:$0xff]  }
  0x29   : > { %3177 = vmatprep.subr.msk.bf16.mxu1 %vm388_vm0, %v2599_v7  ;;  %v1153_v18 = vrot.slane %v1151_v13, 2  ;;  %3182 = vmatprep.subr.msk.bf16.mxu0 %vm388_vm0, %v2657_v17  ;;  %v1170_v29 = vrot.slane %v1168_v24, 2  ;;  %v1177_v35 = vshrl.u32 %v3490_v31, 16  ;;  %v1180_v36 = vshll.u32 %v3490_v31, 16  ;;  %v3258_v38 = vld [vmem:[%s3426_s8 + $0x20] sm:$0xff]   ;;  %v3516_v54 = vld [vmem:[%s3426_s8 + $0x8] sm:$0xff]  }
  0x2a   : > { %v1156_v19 = vrot.slane %v1154_v14, 3  ;;  %v1165_v27 = vor.u32 %v1164_v22, %v1161_v21  ;;  %v1173_v30 = vrot.slane %v1171_v25, 3  ;;  %v1186_v37 = vshrl.u32 %v3493_v32, 16  ;;  %v1359_v41 = vld [vmem:[%s3426_s8 + $0x4] sm:$0x8]  ;;  %v3259_v57 = vld [vmem:[%s3426_s8 + $0x28] sm:$0xff]  }
  0x2b   : > { %2873 = vmatmul.mubr.msk.bf16.vlgmr.msra.gmra.mrb[0].mxu1 %vm363_vm1, %v3250_v2  ;;  %v1408_v39 = vsel %vm388_vm0, %v2657_v17, 0  ;;  %v1189_v40 = vshll.u32 %v3493_v32, 16  ;;  %v1179_v43 = vrot.slane %v1177_v35, 2  ;;  %v1182_v44 = vrot.slane %v1180_v36, 3  ;;  %v2668_v46 = vld [vmem:[%s3444_s29 + $0xc] sm:$0x3] }
  0x2c   : > { %2889 = vmatpush3.bf16.msra.mxu1 %v652_v11  ;;  %v1157_v23 = vor.u32 %v1156_v19, %v1153_v18  ;;  %2876 = vmatprep.mubr.msk.bf16.mxu1 %vm363_vm1, %v3254_v26  ;;  %v1174_v34 = vor.u32 %v1173_v30, %v1170_v29  ;;  %v1188_v45 = vrot.slane %v1186_v37, 2  ;;  %v2658_v48 = vcombine.low %v1359_v41, %v3449_v4  ;;  %v503_v53 = vld [vmem:[%s3426_s8] sm:$0xf]  ;;  %v3520_v56 = vld [vmem:[%s3426_s8 + $0x4] sm:$0xf]  ;;  %v3261_v60 = vld [vmem:[%s3426_s8 + $0x30] sm:$0xff]  }
  0x2d   : > { %v1191_v47 = vrot.slane %v1189_v40, 3  ;;  %v1183_v49 = vor.u32 %v1182_v44, %v1179_v43  ;;  %vm1367_vm3 = vcmask 1044480   ;;  %v1369_v52 = vrot.slane %v3470_v12, 3  ;;  %v2617_v61 = vld [vmem:[%s3444_s29 + $0x4] sm:$0x3]  ;;  %v3535_v3 = vld [vmem:[%s3426_s8 + $0x10] sm:$0xff]  }
  0x2e   : > { %v1166_v33 = vsel %vm1149_vm2, %v1157_v23, %v1165_v27  ;;  %v1175_v42 = vsel %vm1149_vm2, %v1165_v27, %v1174_v34  ;;  %v1368_v51 = vrot.slane %v2658_v48, 3  ;;  %v2600_v58 = vcombine.low %v503_v53, %v3520_v56  ;;  %3178 = vmatprep.subr.msk.bf16.mxu1 %vm388_vm0, %v2617_v61  ;;  %v3262_v7 = vld [vmem:[%s3426_s8 + $0x38] ss:$0 sps:$4 sm:$0xff]   ;;  %v3552_v21 = vld [vmem:[%s3426_s8 + $0x2c] sm:$0xff]   ;;  %v3563_v27 = vld [vmem:[%s3426_s8 + $0x20] sm:$0xff]   ;;  %p2714_p10 = scmp.ne.s32.totalorder %s3325_s15, 2 }
  0x2f   : > { %2944 = vmatprep.mubr.msk.bf16.mxu0 %vm363_vm1, %v1166_v33  ;;  %v3510_v50 = vor.u32 %v1191_v47, %v1188_v45  ;;  %v1184_v55 = vsel %vm1149_vm2, %v1174_v34, %v1183_v49  ;;  %v572_v1 = vshll.u32 %v3516_v54, 16  ;;  %v1371_v4 = vrot.slane %v3481_v20, 3  ;;  %v3543_v13 = vld [vmem:[%s3426_s8 + $0x18] sm:$0xff]   ;;  %v3558_v25 = vld [vmem:[%s3444_s29 + $0xe] sm:$0x3] }
  0x30   : > { %2945 = vmatmul.mubr.msk.bf16.vlgmr.msra.gmra.mrb[0].mxu0 %vm363_vm1, %v1175_v42  ;;  %v1370_v62 = vsel %vm1367_vm3, %v1368_v51, %v1369_v52  ;;  %v567_v63 = vshll.u32 %v2600_v58, 16  ;;  %v565_v0 = vshrl.u32 %v2600_v58, 16  ;;  %v1373_v5 = vrot.slane %v3490_v31, 3  ;;  %v3567_v29 = vld [vmem:[%s3426_s8 + $0x3c] sm:$0xf]  ;;  %v3573_v34 = vld [vmem:[%s3426_s8 + $0x28] sm:$0xff]  }
  0x31   : > { %2961 = vmatpush3.bf16.msra.mxu0 %v1408_v39  ;;  %2948 = vmatprep.mubr.msk.bf16.mxu0 %vm363_vm1, %v1184_v55  ;;  %v1193_v59 = vsel %vm1149_vm2, %v1183_v49, %v3510_v50  ;;  %vm563_vm4 = vsmask.f32 7424  ;;  %v574_v11 = vrot.slane %v572_v1, 1  ;;  %v580_v14 = vshll.u32 %v3535_v3, 16  ;;  %v1141_v33 = vld [vmem:[%s3426_s8 + $0x40] sm:$0x7] }
  0x32   : > { %3183 = vmatprep.subr.msk.bf16.mxu0 %vm388_vm0, %v2668_v46  ;;  %v569_v2 = vrot.slane %v567_v63, 1  ;;  %v1372_v15 = vsel %vm1367_vm3, %v1369_v52, %v1371_v4  ;;  %v576_v16 = vshrl.u32 %v3516_v54, 16  ;;  %v1603_v17 = vsel %vm388_vm0, %v2668_v46, 0  ;;  %v3582_v41 = vld [vmem:[%s3426_s8 + $0x34] sm:$0xff]   ;;  %v3593_v48 = vld [vmem:[%s3444_s29 + $0x6] sm:$0x3] }
  0x33   : > { %2877 = vmatmul.mubr.msk.bf16.gmra.mrb[4].mxu1 %vm363_vm1, %v3255_v28  ;;  %v1374_v18 = vsel %vm1367_vm3, %v1371_v4, %v1373_v5  ;;  %v1375_v19 = vrot.slane %v3493_v32, 3  ;;  %v584_v23 = vshrl.u32 %v3535_v3, 16  ;;  %v588_v24 = vshll.u32 %v3543_v13, 16  ;;  %v3598_v51 = vld [vmem:[%s3426_s8 + $0x30] sm:$0xff]  }
  0x34   : > { %2880 = vmatprep.mubr.msk.bf16.mxu1 %vm363_vm1, %v3258_v38  ;;  %v570_v9 = vor.u32 %v569_v2, %v565_v0  ;;  %v582_v26 = vrot.slane %v580_v14, 1  ;;  %v578_v28 = vor.u32 %v576_v16, %v574_v11  ;;  %v1377_v30 = vrot.slane %v3552_v21, 3 }
  0x35   : > { %v590_v36 = vrot.slane %v588_v24, 1  ;;  %v596_v37 = vshll.u32 %v3563_v27, 16  ;;  %v1376_v38 = vsel %vm1367_vm3, %v1373_v5, %v1375_v19  ;;  %v814_v40 = vsel %vm388_vm0, %v2617_v61, 0 }
  0x36   : > { %v575_v22 = vsel %vm563_vm4, %v570_v9, %v574_v11  ;;  %v586_v35 = vor.u32 %v584_v23, %v582_v26  ;;  %v583_v39 = vsel %vm563_vm4, %v578_v28, %v582_v26  ;;  %v592_v42 = vshrl.u32 %v3543_v13, 16  ;;  %v3273_v23 = vld [vmem:[%s3426_s8 + $0xc] sm:$0xff]  }
  0x37   : > { %v1378_v43 = vsel %vm1367_vm3, %v1375_v19, %v1377_v30  ;;  %v3587_v44 = vcombine.low %v3567_v29, %v1141_v33  ;;  %v600_v45 = vshrl.u32 %v3563_v27, 16  ;;  %v604_v46 = vshll.u32 %v3573_v34, 16 }
  0x38   : > { %2949 = vmatmul.mubr.msk.bf16.gmra.mrb[4].mxu0 %vm363_vm1, %v1193_v59  ;;  %v591_v47 = vsel %vm563_vm4, %v586_v35, %v590_v36  ;;  %v598_v49 = vrot.slane %v596_v37, 1  ;;  %v1379_v52 = vrot.slane %v3582_v41, 3  ;;  %v594_v53 = vor.u32 %v592_v42, %v590_v36  ;;  %v3605_v59 = vld [vmem:[%s3426_s8 + $0x38] sm:$0x1f]  }
  0x39   : > { %2962 = vmatprep.mubr.msk.bf16.mxu0 %vm363_vm1, %v1370_v62  ;;  %v1381_v55 = vrot.slane %v3587_v44, 3  ;;  %v606_v58 = vrot.slane %v604_v46, 1  ;;  %v608_v63 = vshrl.u32 %v3573_v34, 16  ;;  %v616_v2 = vshrl.u32 %v3598_v51, 16  ;;  %v3276_v42 = vld [vmem:[%s3426_s8 + $0x1c] sm:$0xff]  }
  0x3a   : > { %v1380_v61 = vsel %vm1367_vm3, %v1377_v30, %v1379_v52  ;;  %v599_v62 = vsel %vm563_vm4, %v594_v53, %v598_v49  ;;  %v620_v4 = vshll.u32 %v3605_v59, 16  ;;  %vm987_vm5 = vcmask 1045504  }
  0x3b   : > { %2881 = vmatmul.mubr.msk.bf16.gmra.mrb[8].mxu1 %vm363_vm1, %v3259_v57  ;;  %v602_v57 = vor.u32 %v600_v45, %v598_v49  ;;  %v1382_v0 = vsel %vm1367_vm3, %v1379_v52, %v1381_v55  ;;  %v988_v9 = vrot.slane %v3458_v8, 2  ;;  %v991_v16 = vrot.slane %v3481_v20, 2  ;;  %v3670_v52 = vld [vmem:[%s3444_s29 + $0x10] sm:$0x3] }
  0x3c   : > { %2884 = vmatprep.mubr.msk.bf16.mxu1 %vm363_vm1, %v3261_v60  ;;  %v612_v60 = vshll.u32 %v3598_v51, 16  ;;  %v622_v14 = vrot.slane %v620_v4, 1  ;;  %v993_v26 = vrot.slane %v3490_v31, 2  ;;  %v624_v20 = vshrl.u32 %v3605_v59, 16 }
  0x3d   : > { %v607_v1 = vsel %vm563_vm4, %v602_v57, %v606_v58  ;;  %v997_v30 = vrot.slane %v3552_v21, 2  ;;  %v775_v35 = vrot.slane %v3516_v54, 1  ;;  %vm773_vm6 = vcmask 1046528  }
  0x3e   : > { %v614_v5 = vrot.slane %v612_v60, 1  ;;  %v3641_v28 = vsel %vm987_vm5, %v991_v16, %v993_v26  ;;  %v1198_v45 = vshll.u32 %v3552_v21, 16  ;;  %v1204_v46 = vshrl.u32 %v3582_v41, 16 }
  0x3f   : > { %v1864_v54 = vsel %vm388_vm0, %v3558_v25, 0 }
  0x40   : > { %2963 = vmatmul.mubr.msk.bf16.vlgmr.msra.gmra.mrb[0].mxu0 %vm363_vm1, %v1372_v15  ;;  %v618_v11 = vor.u32 %v616_v2, %v614_v5  ;;  %v989_v15 = vrot.slane %v3470_v12, 2  ;;  %v995_v12 = vrot.slane %v3493_v32, 2  ;;  %v999_v32 = vrot.slane %v3582_v41, 2 }
  0x41   : > { %2979 = vmatpush3.bf16.msra.mxu0 %v1603_v17  ;;  %2966 = vmatprep.mubr.msk.bf16.mxu0 %vm363_vm1, %v1374_v18  ;;  %v765_v17 = vld [vmem:[%s3426_s8] sm:$0xe]  ;;  %v1206_v57 = vrot.slane %v1204_v46, 2  ;;  %v3750_v46 = vld [vmem:[%s3426_s8 + $0x2c] sm:$0xff]  }
  0x42   : > { %3184 = vmatprep.subr.msk.bf16.mxu0 %vm388_vm0, %v3558_v25  ;;  %v3626_v18 = vsel %vm987_vm5, %v988_v9, %v989_v15  ;;  %v3629_v19 = vsel %vm987_vm5, %v989_v15, %v991_v16  ;;  %v623_v24 = vsel %vm563_vm4, %v618_v11, %v622_v14  ;;  %v2618_v8 = vcombine.low %v765_v17, %v3520_v56  ;;  %v942_v56 = vld [vmem:[%s3426_s8 + $0x40] sm:$0x3]  ;;  %v3718_v17 = vld [vmem:[%s3426_s8 + $0x14] sm:$0xff]  }
  0x43   : > { %2885 = vmatmul.mubr.msk.bf16.gmra.mrb[12].mxu1 %vm363_vm1, %v3262_v7  ;;  %v610_v7 = vor.u32 %v608_v63, %v606_v58  ;;  %v3647_v31 = vsel %vm987_vm5, %v993_v26, %v995_v12  ;;  %v3653_v36 = vsel %vm987_vm5, %v995_v12, %v997_v30  ;;  %v3656_v37 = vsel %vm987_vm5, %v997_v30, %v999_v32 }
  0x44   : > { %2890 = vmatprep.mubr.msk.bf16.mxu1 %vm363_vm1, %v575_v22  ;;  %v774_v33 = vrot.slane %v2618_v8, 1  ;;  %v1213_v25 = vshrl.u32 %v3587_v44, 16  ;;  %v777_v58 = vrot.slane %v3535_v3, 1  ;;  %v779_v63 = vrot.slane %v3543_v13, 1  ;;  %v3281_v8 = vld [vmem:[%s3426_s8 + $0x3c] sm:$0xff]  }
  0x45   : > { %v615_v22 = vsel %vm563_vm4, %v610_v7, %v614_v5  ;;  %v3277_v5 = vld [vmem:[%s3426_s8 + $0x24] sm:$0xff]   ;;  %v3279_v7 = vld [vmem:[%s3426_s8 + $0x2c] sm:$0xff]   ;;  %v1028_v13 = vsel %vm388_vm0, %v3593_v48, 0  ;;  %v781_v16 = vrot.slane %v3563_v27, 1 }
  0x48   : > { %2967 = vmatmul.mubr.msk.bf16.gmra.mrb[4].mxu0 %vm363_vm1, %v1376_v38  ;;  %v3274_v38 = vld [vmem:[%s3426_s8 + $0x14] sm:$0xff]  }
  0x49   : > { %2970 = vmatprep.mubr.msk.bf16.mxu0 %vm363_vm1, %v1378_v43  ;;  %v1195_v43 = vshrl.u32 %v3552_v21, 16 }
  0x4b   : > { %2891 = vmatmul.mubr.msk.bf16.vlgmr.msra.gmra.mrb[0].mxu1 %vm363_vm1, %v583_v39  ;;  %v626_v39 = vor.u32 %v624_v20, %v622_v14  ;;  %v1197_v53 = vrot.slane %v1195_v43, 2  ;;  %v780_v14 = vsel %vm773_vm6, %v777_v58, %v779_v63  ;;  %v1784_v20 = vshll.u32 %v3718_v17, 16 }
  0x4c   : > { %2907 = vmatpush3.bf16.msra.mxu1 %v814_v40  ;;  %2894 = vmatprep.mubr.msk.bf16.mxu1 %vm363_vm1, %v591_v47  ;;  %v2636_v40 = vcombine.low %v3567_v29, %v942_v56  ;;  %v776_v47 = vsel %vm773_vm6, %v774_v33, %v775_v35  ;;  %v1207_v29 = vshll.u32 %v3582_v41, 16  ;;  %v787_v56 = vrot.slane %v3605_v59, 1  ;;  %v3737_v33 = vld [vmem:[%s3426_s8 + $0x24] sm:$0xff]  }
  0x4d   : > { %3179 = vmatprep.subr.msk.bf16.mxu1 %vm388_vm0, %v3593_v48  ;;  %v783_v48 = vrot.slane %v3573_v34, 1  ;;  %v3730_v34 = vld [vmem:[%s3426_s8 + $0x1c] sm:$0xff]  }
  0x4e   : > { %v3667_v49 = vrot.slane %v2636_v40, 2  ;;  %v1209_v41 = vrot.slane %v1207_v29, 3  ;;  %v1788_v40 = vshrl.u32 %v3718_v17, 16 }
  0x4f   : > { %v784_v26 = vsel %vm773_vm6, %v781_v16, %v783_v48 }
  0x50   : > { %2971 = vmatmul.mubr.msk.bf16.gmra.mrb[8].mxu0 %vm363_vm1, %v1380_v61  ;;  %v3677_v21 = vsel %vm987_vm5, %v999_v32, %v3667_v49  ;;  %v1216_v61 = vshll.u32 %v3587_v44, 16  ;;  %v1210_v3 = vor.u32 %v1209_v41, %v1206_v57  ;;  %v778_v44 = vsel %vm773_vm6, %v775_v35, %v777_v58  ;;  %v3282_v35 = vld [vmem:[%s3426_s8 + $0x44] ss:$0 sps:$4 sm:$0xff]  }
  0x51   : > { %2974 = vmatprep.mubr.msk.bf16.mxu0 %vm363_vm1, %v1382_v0  ;;  %v1716_v0 = vld [vmem:[%s3426_s8 + $0xc] sm:$0xf]  ;;  %v1786_v32 = vrot.slane %v1784_v20, 1  ;;  %v1808_v57 = vshll.u32 %v3750_v46, 16  ;;  %v2025_v58 = vsel %vm388_vm0, %v3670_v52, 0  ;;  %v1812_v41 = vshrl.u32 %v3750_v46, 16 }
  0x52   : > { %v1218_v4 = vrot.slane %v1216_v61, 3 }
  0x53   : > { %2895 = vmatmul.mubr.msk.bf16.gmra.mrb[4].mxu1 %vm363_vm1, %v599_v62  ;;  %v1215_v62 = vrot.slane %v1213_v25, 2  ;;  %v1804_v25 = vshrl.u32 %v3737_v33, 16 }
  0x54   : > { %2898 = vmatprep.mubr.msk.bf16.mxu1 %vm363_vm1, %v607_v1  ;;  %v3689_v1 = vld [vmem:[%s3426_s8 + $0x10] sm:$0xf] }
  0x55   : > { %v3701_v11 = vor.u32 %v1218_v4, %v1215_v62  ;;  %v1810_v62 = vrot.slane %v1808_v57, 1  ;;  %v3290_v4 = vld [vmem:[%s3426_s8 + $0x44] sm:$0x1f]  }
  0x57   : > { %v3709_v15 = vsel %vm1149_vm2, %v1210_v3, %v3701_v11 }
  0x58   : > { %2975 = vmatmul.mubr.msk.bf16.gmra.mrb[12].mxu0 %vm363_vm1, %v1381_v55  ;;  %v1200_v55 = vrot.slane %v1198_v45, 3  ;;  %v1800_v45 = vshll.u32 %v3737_v33, 16 }
  0x59   : > { %2980 = vmatprep.mubr.msk.bf16.mxu0 %vm363_vm1, %v3273_v23  ;;  %v3280_v23 = vld [vmem:[%s3426_s8 + $0x34] sm:$0xff]  }
  0x5a   : > { %v1201_v60 = vor.u32 %v1200_v55, %v1197_v53  ;;  %v1802_v53 = vrot.slane %v1800_v45, 1  ;;  %v3755_v55 = vld [vmem:[%s3426_s8 + $0x34] sm:$0xff]   ;;  %v292_v45 = vld [vmem:[#allocation2 + $0x8] sm:$0xff] }
  0x5b   : > { %2899 = vmatmul.mubr.msk.bf16.gmra.mrb[8].mxu1 %vm363_vm1, %v615_v22  ;;  %v1816_v61 = vshll.u32 %v3755_v55, 16 }
  0x5c   : > { %2902 = vmatprep.mubr.msk.bf16.mxu1 %vm363_vm1, %v623_v24  ;;  %v3693_v2 = vsel %vm1149_vm2, %v3510_v50, %v1201_v60  ;;  %v3699_v9 = vsel %vm1149_vm2, %v1201_v60, %v1210_v3  ;;  %v2687_v50 = vcombine.low %v1716_v0, %v3689_v1  ;;  %v782_v24 = vsel %vm773_vm6, %v779_v63, %v781_v16  ;;  %v3289_v63 = vld [vmem:[%s3426_s8 + $0x3c] sm:$0xff]  }
  0x5d   : > { %v1806_v0 = vor.u32 %v1804_v25, %v1802_v53  ;;  %v1818_v3 = vrot.slane %v1816_v61, 1  ;;  %v298_v61 = vld [vmem:[#allocation2 + $0x38] sm:$0xff] }
  0x5e   : > { %v1779_v22 = vshll.u32 %v2687_v50, 16  ;;  %v1777_v12 = vshrl.u32 %v2687_v50, 16  ;;  %v1828_v50 = vshrl.u32 %v3289_v63, 16 }
  0x60   : > { %2981 = vmatmul.mubr.msk.bf16.vlgmr.msra.gmra.mrb[0].mxu0 %vm363_vm1, %v3274_v38  ;;  %v1781_v27 = vrot.slane %v1779_v22, 1  ;;  %v1792_v38 = vshll.u32 %v3730_v34, 16 }
  0x61   : > { %2997 = vmatpush3.bf16.msra.mxu0 %v1864_v54  ;;  %2984 = vmatprep.mubr.msk.bf16.mxu0 %vm363_vm1, %v3276_v42  ;;  %v1790_v54 = vor.u32 %v1788_v40, %v1786_v32  ;;  %v293_v40 = vld [vmem:[#allocation2 + $0x10] sm:$0xff] }
  0x62   : > { %3185 = vmatprep.subr.msk.bf16.mxu0 %vm388_vm0, %v3670_v52  ;;  %v1782_v30 = vor.u32 %v1781_v27, %v1777_v12  ;;  %v1794_v59 = vrot.slane %v1792_v38, 1  ;;  %v1814_v52 = vor.u32 %v1812_v41, %v1810_v62  ;;  %v295_v41 = vld [vmem:[#allocation2 + $0x20] sm:$0xff] }
  0x63   : > { %2903 = vmatmul.mubr.msk.bf16.gmra.mrb[12].mxu1 %vm363_vm1, %v626_v39 }
  0x64   : > { %2908 = vmatprep.mubr.msk.bf16.mxu1 %vm363_vm1, %v776_v47  ;;  %v1787_v42 = vsel %vm563_vm4, %v1782_v30, %v1786_v32  ;;  %v1795_v29 = vsel %vm563_vm4, %v1790_v54, %v1794_v59 }
  0x68   : > { %2985 = vmatmul.mubr.msk.bf16.gmra.mrb[4].mxu0 %vm363_vm1, %v3277_v5  ;;  %v1824_v5 = vshll.u32 %v3289_v63, 16 }
  0x69   : > { %2988 = vmatprep.mubr.msk.bf16.mxu0 %vm363_vm1, %v3279_v7  ;;  %v1820_v7 = vshrl.u32 %v3755_v55, 16 }
  0x6a   : > { %v1826_v16 = vrot.slane %v1824_v5, 1 }
  0x6b   : > { %2909 = vmatmul.mubr.msk.bf16.vlgmr.msra.gmra.mrb[0].mxu1 %vm363_vm1, %v778_v44  ;;  %v1811_v44 = vsel %vm563_vm4, %v1806_v0, %v1810_v62 }
  0x6c   : > { %2925 = vmatpush3.bf16.msra.mxu1 %v1028_v13  ;;  %2912 = vmatprep.mubr.msk.bf16.mxu1 %vm363_vm1, %v780_v14  ;;  %v1819_v13 = vsel %vm563_vm4, %v1814_v52, %v1818_v3  ;;  %v1832_v14 = vshll.u32 %v3290_v4, 16 }
  0x6d   : > { %3181 = vmatprep.subr.msk.bf16.mxu1 %vm388_vm0, %v3453_v6  ;;  %v785_v6 = vrot.slane %v3598_v51, 1  ;;  %v1796_v51 = vshrl.u32 %v3730_v34, 16 }
  0x6e   : > { %v1834_v22 = vrot.slane %v1832_v14, 1 }
  0x6f   : > { %v786_v39 = vsel %vm773_vm6, %v783_v48, %v785_v6  ;;  %v788_v43 = vsel %vm773_vm6, %v785_v6, %v787_v56  ;;  %v1798_v47 = vor.u32 %v1796_v51, %v1794_v59  ;;  %v1830_v48 = vor.u32 %v1828_v50, %v1826_v16 }
  0x70   : > { %2989 = vmatmul.mubr.msk.bf16.gmra.mrb[8].mxu0 %vm363_vm1, %v3280_v23  ;;  %v1977_v23 = vld [vmem:[%s3426_s8 + $0xc] sm:$0xe]  ;;  %v1998_v6 = vrot.slane %v3290_v4, 1 }
  0x71   : > { %2992 = vmatprep.mubr.msk.bf16.mxu0 %vm363_vm1, %v3281_v8  ;;  %v1803_v60 = vsel %vm563_vm4, %v1798_v47, %v1802_v53  ;;  %v1835_v8 = vsel %vm563_vm4, %v1830_v48, %v1834_v22 }
  0x73   : > { %2913 = vmatmul.mubr.msk.bf16.gmra.mrb[4].mxu1 %vm363_vm1, %v782_v24 }
  0x74   : > { %2916 = vmatprep.mubr.msk.bf16.mxu1 %vm363_vm1, %v784_v26  ;;  %v2705_v26 = vcombine.low %v1977_v23, %v3689_v1  ;;  %v299_v23 = vld [vmem:[#allocation2 + $0x40] sm:$0xff] }
  0x78   : > { %2993 = vmatmul.mubr.msk.bf16.gmra.mrb[12].mxu0 %vm363_vm1, %v3282_v35 }
  0x79   : > { %2998 = vmatprep.mubr.msk.bf16.mxu0 %vm363_vm1, %v1787_v42  ;;  %v291_v42 = vld [vmem:[#allocation2] sm:$0xff] }
  0x7b   : > { %2917 = vmatmul.mubr.msk.bf16.gmra.mrb[8].mxu1 %vm363_vm1, %v786_v39 }
  0x7c   : > { %2920 = vmatprep.mubr.msk.bf16.mxu1 %vm363_vm1, %v788_v43  ;;  %v294_v43 = vld [vmem:[#allocation2 + $0x18] sm:$0xff] }
  0x80   : > { %2999 = vmatmul.mubr.msk.bf16.vlgmr.msra.gmra.mrb[0].mxu0 %vm363_vm1, %v1795_v29 }
  0x81   : > { %3015 = vmatpush3.bf16.msra.mxu0 %v2025_v58  ;;  %3002 = vmatprep.mubr.msk.bf16.mxu0 %vm363_vm1, %v1803_v60  ;;  %v297_v58 = vld [vmem:[#allocation2 + $0x30] sm:$0xff] }
  0x83   : > { %2921 = vmatmul.mubr.msk.bf16.gmra.mrb[12].mxu1 %vm363_vm1, %v787_v56 }
  0x84   : > { %2926 = vmatprep.mubr.msk.bf16.mxu1 %vm363_vm1, %v3626_v18  ;;  %v1822_v18 = vor.u32 %v1820_v7, %v1818_v3 }
  0x86   : > { %v1827_v24 = vsel %vm563_vm4, %v1822_v18, %v1826_v16  ;;  %v301_v16 = vld [vmem:[#allocation2 + $0x50] sm:$0xff] }
  0x88   : > { %3003 = vmatmul.mubr.msk.bf16.gmra.mrb[4].mxu0 %vm363_vm1, %v1811_v44 }
  0x89   : > { %3006 = vmatprep.mubr.msk.bf16.mxu0 %vm363_vm1, %v1819_v13 }
  0x8b   : > { %2927 = vmatmul.mubr.msk.bf16.vlgmr.msra.gmra.mrb[0].mxu1 %vm363_vm1, %v3629_v19  ;;  %v1985_v19 = vrot.slane %v2705_v26, 1  ;;  %v302_v26 = vld [vmem:[#allocation2 + $0x58] sm:$0xff] }
  0x8c   : > { %3033 = vmatpush3.bf16.msra.mxu1 %v3466_v10  ;;  %2930 = vmatprep.mubr.msk.bf16.mxu1 %vm363_vm1, %v3641_v28  ;;  %v1836_v10 = vshrl.u32 %v3290_v4, 16  ;;  %v1986_v28 = vrot.slane %v3718_v17, 1 }
  0x8e   : > { %v1838_v12 = vor.u32 %v1836_v10, %v1834_v22  ;;  %v1987_v27 = vsel %vm773_vm6, %v1985_v19, %v1986_v28  ;;  %v300_v19 = vld [vmem:[#allocation2 + $0x48] sm:$0xff] }
  0x90   : > { %3007 = vmatmul.mubr.msk.bf16.gmra.mrb[8].mxu0 %vm363_vm1, %v1827_v24 }
  0x91   : > { %3010 = vmatprep.mubr.msk.bf16.mxu0 %vm363_vm1, %v1835_v8 }
  0x93   : > { %2931 = vmatmul.mubr.msk.bf16.gmra.mrb[4].mxu1 %vm363_vm1, %v3647_v31  ;;  %v1988_v31 = vrot.slane %v3730_v34, 1 }
  0x94   : > { %2934 = vmatprep.mubr.msk.bf16.mxu1 %vm363_vm1, %v3653_v36  ;;  %v1990_v36 = vrot.slane %v3737_v33, 1 }
  0x95   : > { %v1989_v1 = vsel %vm773_vm6, %v1986_v28, %v1988_v31 }
  0x96   : > { %v1991_v17 = vsel %vm773_vm6, %v1988_v31, %v1990_v36 }
  0x98   : > { %3011 = vmatmul.mubr.msk.bf16.gmra.mrb[12].mxu0 %vm363_vm1, %v1838_v12 }
  0x99   : > { %3016 = vmatprep.mubr.msk.bf16.mxu0 %vm363_vm1, %v1987_v27 }
  0x9b   : > { %2935 = vmatmul.mubr.msk.bf16.gmra.mrb[8].mxu1 %vm363_vm1, %v3656_v37  ;;  %v1992_v37 = vrot.slane %v3750_v46, 1 }
  0x9c   : > { %2938 = vmatprep.mubr.msk.bf16.mxu1 %vm363_vm1, %v3677_v21  ;;  %v1994_v21 = vrot.slane %v3755_v55, 1 }
  0x9d   : > { %v1993_v20 = vsel %vm773_vm6, %v1990_v36, %v1992_v37 }
  0x9e   : > { %v1995_v34 = vsel %vm773_vm6, %v1992_v37, %v1994_v21 }
  0xa0   : > { %3017 = vmatmul.mubr.msk.bf16.vlgmr.msra.gmra.mrb[0].mxu0 %vm363_vm1, %v1989_v1 }
  0xa1   : > { %3020 = vmatprep.mubr.msk.bf16.mxu0 %vm363_vm1, %v1991_v17 }
  0xa3   : > { %2939 = vmatmul.mubr.msk.bf16.gmra.mrb[12].mxu1 %vm363_vm1, %v3667_v49  ;;  %v1996_v49 = vrot.slane %v3289_v63, 1  ;;  %v296_v63 = vld [vmem:[#allocation2 + $0x28] sm:$0xff] }
  0xa4   : > { %2952 = vmatprep.mubr.msk.bf16.mxu1 %vm363_vm1, %v3693_v2 }
  0xa5   : > { %v1997_v2 = vsel %vm773_vm6, %v1994_v21, %v1996_v49  ;;  %v1999_v30 = vsel %vm773_vm6, %v1996_v49, %v1998_v6 }
  0xa8   : > { %3021 = vmatmul.mubr.msk.bf16.gmra.mrb[4].mxu0 %vm363_vm1, %v1993_v20 }
  0xa9   : > { %3024 = vmatprep.mubr.msk.bf16.mxu0 %vm363_vm1, %v1995_v34  ;;  %v305_v34 = vld [vmem:[#allocation2 + $0x70] sm:$0xff] }
  0xab   : > { %2953 = vmatmul.mubr.msk.bf16.vlgmr.msra.gmra.mrb[8].mxu1 %vm363_vm1, %v3699_v9 }
  0xac   : > { %2956 = vmatprep.mubr.msk.bf16.mxu1 %vm363_vm1, %v3709_v15 }
  0xb0   : > { %3025 = vmatmul.mubr.msk.bf16.gmra.mrb[8].mxu0 %vm363_vm1, %v1997_v2 }
  0xb1   : > { %3028 = vmatprep.mubr.msk.bf16.mxu0 %vm363_vm1, %v1999_v30  ;;  %v303_v30 = vld [vmem:[#allocation2 + $0x60] sm:$0xff] }
  0xb3   : > { %2957 = vmatmul.mubr.msk.bf16.gmra.mrb[12].mxu1 %vm363_vm1, %v3701_v11 }
  0xb8   : > { %3029 = vmatmul.mubr.msk.bf16.gmra.mrb[12].mxu0 %vm363_vm1, %v1998_v6 }
 0x15e   : > { %v2928_v9 = vpop.f32.mrb[0].mxu1 }
 0x15f   : > { %v1064_v32 = vpop.f32.mrb[1].mxu1  ;;  %v3034_v51 = vadd.f32 %v2928_v9, %v293_v40 }
 0x160   : > { %v2929_v56 = vpop.f32.mrb[2].mxu1  ;;  %v3036_v59 = vadd.f32 %v1064_v32, %v291_v42 }
 0x161   : > { %v1067_v33 = vpop.f32.mrb[3].mxu1  ;;  %v3038_v11 = vadd.f32 %v2929_v56, %v294_v43 }
 0x162   : > { %v3040_v53 = vadd.f32 %v1067_v33, %v292_v45  ;;  %v304_v33 = vld [vmem:[#allocation2 + $0x68] sm:$0xff] }
 0x166   : > { %v2932_v35 = vpop.f32.mrb[4].mxu1 }
 0x167   : > { %v1080_v15 = vpop.f32.mrb[5].mxu1  ;;  %v3042_v62 = vadd.f32 %v2932_v35, %v297_v58  ;;  %v2240_v58 = vld [vmem:[%s3997_s2 + $0x38] sm:$0xff] (!%p2714_p10) }
 0x168   : > { %v2933_v38 = vpop.f32.mrb[6].mxu1  ;;  %v3044_v0 = vadd.f32 %v1080_v15, %v295_v41  ;;  %v2239_v41 = vld [vmem:[%s3997_s2 + $0x30] sm:$0xff] (!%p2714_p10) }
 0x169   : > { %v1083_v39 = vpop.f32.mrb[7].mxu1  ;;  %v3046_v4 = vadd.f32 %v2933_v38, %v298_v61  ;;  %v2242_v61 = vld [vmem:[%s3997_s2 + $0x48] sm:$0xff] (!%p2714_p10) }
 0x16a   : > { %v3048_v13 = vadd.f32 %v1083_v39, %v296_v63  ;;  %v2244_v63 = vld [vmem:[%s3997_s2 + $0x58] sm:$0xff] (!%p2714_p10) }
 0x173   : > { %v3018_v46 = vpop.f32.mrb[0].mxu0 }
 0x174   : > { %v3827_v54 = vadd.f32 %v3034_v51, %v3018_v46  ;;  %v2061_v47 = vpop.f32.mrb[1].mxu0  ;;  %v2233_v46 = vld [vmem:[%s3997_s2] sm:$0xff] (!%p2714_p10) }
 0x175   : > { %v3829_v55 = vadd.f32 %v3036_v59, %v2061_v47  ;;  %v3019_v57 = vpop.f32.mrb[2].mxu0  ;;  %v2235_v59 = vld [vmem:[%s3997_s2 + $0x10] sm:$0xff] (!%p2714_p10)  ;;  %v2236_v47 = vld [vmem:[%s3997_s2 + $0x18] sm:$0xff] (!%p2714_p10) }
 0x176   : > { %2140 = vst [vmem:[#allocation2 + $0x10] sm:$0xff] %v3827_v54  ;;  %v3832_v29 = vadd.f32 %v3038_v11, %v3019_v57  ;;  %v2064_v25 = vpop.f32.mrb[3].mxu0  ;;  %v3352_v11 = vmov (!%p2714_p10), 0   ;;  %v2238_v57 = vld [vmem:[%s3997_s2 + $0x28] sm:$0xff] (!%p2714_p10) }
 0x177   : > { %2138 = vst [vmem:[#allocation2] sm:$0xff] %v3829_v55  ;;  %v3835_v60 = vadd.f32 %v3040_v53, %v2064_v25  ;;  %3294 = vset.pattern.permute.xlu1 (!%p2714_p10), %v3352_v11  ;;  %3293 = vset.pattern.permute.xlu0 (!%p2714_p10), %v3352_v11  ;;  %v2234_v53 = vld [vmem:[%s3997_s2 + $0x8] sm:$0xff] (!%p2714_p10)  ;;  %v2237_v25 = vld [vmem:[%s3997_s2 + $0x20] sm:$0xff] (!%p2714_p10) }
 0x178   : > { %2141 = vst [vmem:[#allocation2 + $0x18] sm:$0xff] %v3832_v29  ;;  %2260 = vperm.xlu1 (!%p2714_p10), %3294, %v2235_v59   ;;  %2250 = vperm.xlu0 (!%p2714_p10), %3293, %v2233_v46  }
 0x179   : > { %2139 = vst [vmem:[#allocation2 + $0x8] sm:$0xff] %v3835_v60 }
 0x17b   : > { %v3022_v52 = vpop.f32.mrb[4].mxu0 }
 0x17c   : > { %v3839_v5 = vadd.f32 %v3042_v62, %v3022_v52  ;;  %v2077_v44 = vpop.f32.mrb[5].mxu0  ;;  %2265 = vperm.xlu1 (!%p2714_p10), %3294, %v2236_v47   ;;  %2255 = vperm.xlu0 (!%p2714_p10), %3293, %v2234_v53   ;;  %v2241_v62 = vld [vmem:[%s3997_s2 + $0x40] sm:$0xff] (!%p2714_p10)  ;;  %v2246_v52 = vld [vmem:[%s3997_s2 + $0x68] sm:$0xff] (!%p2714_p10) }
 0x17d   : > { %v3841_v50 = vadd.f32 %v3044_v0, %v2077_v44  ;;  %v3023_v14 = vpop.f32.mrb[6].mxu0  ;;  %v2243_v0 = vld [vmem:[%s3997_s2 + $0x50] sm:$0xff] (!%p2714_p10) }
 0x17e   : > { %v2954_v3 = vpop.f32.mrb[8].mxu1  ;;  %2144 = vst [vmem:[#allocation2 + $0x30] sm:$0xff] %v3839_v5  ;;  %v3844_v48 = vadd.f32 %v3046_v4, %v3023_v14  ;;  %v2080_v22 = vpop.f32.mrb[7].mxu0  ;;  %v2247_v4 = vld [vmem:[%s3997_s2 + $0x70] sm:$0xff] (!%p2714_p10) }
 0x17f   : > { %v1314_v7 = vpop.f32.mrb[9].mxu1  ;;  %2142 = vst [vmem:[#allocation2 + $0x20] sm:$0xff] %v3841_v50  ;;  %v3847_v8 = vadd.f32 %v3048_v13, %v2080_v22  ;;  %v3050_v10 = vadd.f32 %v2954_v3, %v301_v16  ;;  %v2245_v3 = vld [vmem:[%s3997_s2 + $0x60] sm:$0xff] (!%p2714_p10)  ;;  %v2756_v13 = vpack.c.bf16 (!%p2714_p10), %v3832_v29, %v3827_v54 }
 0x180   : > { %v2955_v18 = vpop.f32.mrb[10].mxu1  ;;  %2145 = vst [vmem:[#allocation2 + $0x38] sm:$0xff] %v3844_v48  ;;  %v3052_v28 = vadd.f32 %v1314_v7, %v299_v23  ;;  %2275 = vperm.xlu1 (!%p2714_p10), %3294, %v2238_v57   ;;  %2270 = vperm.xlu0 (!%p2714_p10), %3293, %v2237_v25   ;;  %v2751_v7 = vpack.c.bf16 (!%p2714_p10), %v3835_v60, %v3829_v55 }
 0x181   : > { %v1317_v24 = vpop.f32.mrb[11].mxu1  ;;  %2143 = vst [vmem:[#allocation2 + $0x28] sm:$0xff] %v3847_v8  ;;  %v3054_v12 = vadd.f32 %v2955_v18, %v302_v26  ;;  %v2761_v14 = vpack.c.bf16 (!%p2714_p10), %v3847_v8, %v3841_v50  ;;  %v2766_v16 = vpack.c.bf16 (!%p2714_p10), %v3844_v48, %v3839_v5  ;;  %2783 = vst [vmem:[%s3431_s24 + $0x8] sm:$0xff] (!%p2714_p10), %v2756_v13  }
 0x182   : > { %v3056_v27 = vadd.f32 %v1317_v24, %v300_v19  ;;  %2752 = vst [vmem:[%s3431_s24] sm:$0xff] (!%p2714_p10), %v2751_v7  }
 0x183   : > { %v3026_v31 = vpop.f32.mrb[8].mxu0  ;;  %2784 = vst [vmem:[%s3431_s24 + $0x10] sm:$0xff] (!%p2714_p10), %v2761_v14   ;;  %2785 = vst [vmem:[%s3431_s24 + $0x18] sm:$0xff] (!%p2714_p10), %v2766_v16  }
 0x184   : > { %v3851_v1 = vadd.f32 %v3050_v10, %v3026_v31  ;;  %v2093_v17 = vpop.f32.mrb[9].mxu0  ;;  %2285 = vperm.xlu1 (!%p2714_p10), %3294, %v2240_v58   ;;  %2280 = vperm.xlu0 (!%p2714_p10), %3293, %v2239_v41  }
 0x185   : > { %v3853_v21 = vadd.f32 %v3052_v28, %v2093_v17  ;;  %v3027_v20 = vpop.f32.mrb[10].mxu0 }
 0x186   : > { %v2958_v36 = vpop.f32.mrb[12].mxu1  ;;  %2148 = vst [vmem:[#allocation2 + $0x50] sm:$0xff] %v3851_v1  ;;  %v3856_v6 = vadd.f32 %v3054_v12, %v3027_v20  ;;  %v2096_v2 = vpop.f32.mrb[11].mxu0 }
 0x187   : > { %v1330_v37 = vpop.f32.mrb[13].mxu1  ;;  %2146 = vst [vmem:[#allocation2 + $0x40] sm:$0xff] %v3853_v21  ;;  %v3859_v32 = vadd.f32 %v3056_v27, %v2096_v2  ;;  %v3058_v56 = vadd.f32 %v2958_v36, %v305_v34 }
 0x188   : > { %v2959_v49 = vpop.f32.mrb[14].mxu1  ;;  %2149 = vst [vmem:[#allocation2 + $0x58] sm:$0xff] %v3856_v6  ;;  %v3060_v35 = vadd.f32 %v1330_v37, %v303_v30  ;;  %2295 = vperm.xlu1 (!%p2714_p10), %3294, %v2242_v61   ;;  %2290 = vperm.xlu0 (!%p2714_p10), %3293, %v2241_v62   ;;  %v2776_v22 = vpack.c.bf16 (!%p2714_p10), %v3856_v6, %v3851_v1 }
 0x189   : > { %v1333_v9 = vpop.f32.mrb[15].mxu1  ;;  %2147 = vst [vmem:[#allocation2 + $0x48] sm:$0xff] %v3859_v32  ;;  %v2771_v18 = vpack.c.bf16 (!%p2714_p10), %v3859_v32, %v3853_v21 }
 0x18a   : > { %v3062_v15 = vadd.f32 %v1333_v9, %v304_v33  ;;  %2787 = vst [vmem:[%s3431_s24 + $0x28] sm:$0xff] (!%p2714_p10), %v2776_v22  }
 0x18b   : > { %v3030_v38 = vpop.f32.mrb[12].mxu0  ;;  %2156 = sbr.rel (%p2714_p10) target bundleno = 541 (0x21d), region = 40  ;;  %2786 = vst [vmem:[%s3431_s24 + $0x20] sm:$0xff] (!%p2714_p10), %v2771_v18  }
 0x18c   : > { %v3863_v39 = vadd.f32 %v3058_v56, %v3030_v38  ;;  %v2109_v40 = vpop.f32.mrb[13].mxu0  ;;  %2305 = vperm.xlu1 (!%p2714_p10), %3294, %v2244_v63   ;;  %2300 = vperm.xlu0 (!%p2714_p10), %3293, %v2243_v0  }
 0x18d   : > { %v3865_v42 = vadd.f32 %v3060_v35, %v2109_v40  ;;  %v3031_v43 = vpop.f32.mrb[14].mxu0 }
 0x18e   : > { %2152 = vst [vmem:[#allocation2 + $0x70] sm:$0xff] %v3863_v39  ;;  %v2112_v51 = vpop.f32.mrb[15].mxu0  ;;  %v2747_v44 = vpack.c.bf16 (!%p2714_p10), %v3863_v39, %v3863_v39 }
 0x18f   : > { %2150 = vst [vmem:[#allocation2 + $0x60] sm:$0xff] %v3865_v42  ;;  %v3869_v45 = vadd.f32 %v3062_v15, %v2112_v51 }
 0x190   : > { %2315 = vperm.xlu1 (!%p2714_p10), %3294, %v2246_v52   ;;  %2310 = vperm.xlu0 (!%p2714_p10), %3293, %v2245_v3   ;;  %2232 = vst [vmem:[%s3431_s24 + $0x38] sm:$0xf] (!%p2714_p10), %v2747_v44 }
 0x191   : > { %2151 = vst [vmem:[#allocation2 + $0x68] sm:$0xff] %v3869_v45  ;;  %v2781_v23 = vpack.c.bf16 (!%p2714_p10), %v3869_v45, %v3865_v42 }
 0x193   : > { %2788 = vst [vmem:[%s3431_s24 + $0x30] sm:$0xff] %v2781_v23  }
 0x194   : > { %2320 = vperm.xlu0 %3293, %v2247_v4  }
 0x1f7   : > { %v2261_v24 = vpop.permute.xlu1 %2260  ;;  %v2251_v26 = vpop.permute.xlu0 %2250 }
 0x1f8   : > { %v2323_v10 = vmul.f32 %v3829_v55, %v2251_v26  ;;  %v2325_v12 = vmul.f32 %v3827_v54, %v2261_v24 }
 0x1fa   : > { %v2338_v31 = vmul.f32 %v3829_v55, %v2323_v10  ;;  %v2340_v49 = vmul.f32 %v3827_v54, %v2325_v12 }
 0x1fb   : > { %v2266_v19 = vpop.permute.xlu1 %2265  ;;  %v2256_v28 = vpop.permute.xlu0 %2255 }
 0x1fc   : > { %v2324_v27 = vmul.f32 %v3835_v60, %v2256_v28  ;;  %v2326_v36 = vmul.f32 %v3832_v29, %v2266_v19 }
 0x1fe   : > { %v2339_v17 = vmul.f32 %v3835_v60, %v2324_v27  ;;  %v2353_v37 = vadd.f32 %v2324_v27, %v2323_v10  ;;  %v2341_v56 = vmul.f32 %v3832_v29, %v2326_v36 }
 0x1ff   : > { %v2276_v20 = vpop.permute.xlu1 %2275  ;;  %v2271_v34 = vpop.permute.xlu0 %2270 }
 0x200   : > { %v2354_v2 = vadd.f32 %v2353_v37, %v2325_v12  ;;  %v2368_v30 = vadd.f32 %v2339_v17, %v2338_v31  ;;  %v2327_v9 = vmul.f32 %v3841_v50, %v2271_v34  ;;  %v2328_v35 = vmul.f32 %v3847_v8, %v2276_v20 }
 0x202   : > { %v2369_v33 = vadd.f32 %v2368_v30, %v2340_v49  ;;  %v2355_v15 = vadd.f32 %v2354_v2, %v2326_v36  ;;  %v2342_v60 = vmul.f32 %v3841_v50, %v2327_v9  ;;  %v2343_v54 = vmul.f32 %v3847_v8, %v2328_v35 }
 0x203   : > { %v2286_v55 = vpop.permute.xlu1 %2285  ;;  %v2281_v38 = vpop.permute.xlu0 %2280 }
 0x204   : > { %v2370_v40 = vadd.f32 %v2369_v33, %v2341_v56  ;;  %v2356_v43 = vadd.f32 %v2355_v15, %v2327_v9  ;;  %v2329_v51 = vmul.f32 %v3839_v5, %v2281_v38  ;;  %v2330_v46 = vmul.f32 %v3844_v48, %v2286_v55 }
 0x206   : > { %v2371_v59 = vadd.f32 %v2370_v40, %v2342_v60  ;;  %v2357_v11 = vadd.f32 %v2356_v43, %v2328_v35  ;;  %v2344_v57 = vmul.f32 %v3839_v5, %v2329_v51  ;;  %v2345_v41 = vmul.f32 %v3844_v48, %v2330_v46 }
 0x207   : > { %v2296_v47 = vpop.permute.xlu1 %2295  ;;  %v2291_v29 = vpop.permute.xlu0 %2290 }
 0x208   : > { %v2372_v53 = vadd.f32 %v2371_v59, %v2343_v54  ;;  %v2358_v25 = vadd.f32 %v2357_v11, %v2329_v51  ;;  %v2331_v58 = vmul.f32 %v3853_v21, %v2291_v29  ;;  %v2332_v61 = vmul.f32 %v3859_v32, %v2296_v47 }
 0x20a   : > { %v2373_v50 = vadd.f32 %v2372_v53, %v2344_v57  ;;  %v2359_v62 = vadd.f32 %v2358_v25, %v2330_v46  ;;  %v2346_v52 = vmul.f32 %v3853_v21, %v2331_v58  ;;  %v2347_v44 = vmul.f32 %v3859_v32, %v2332_v61 }
 0x20b   : > { %v2306_v63 = vpop.permute.xlu1 %2305  ;;  %v2301_v8 = vpop.permute.xlu0 %2300 }
 0x20c   : > { %v2374_v0 = vadd.f32 %v2373_v50, %v2345_v41  ;;  %v2360_v3 = vadd.f32 %v2359_v62, %v2331_v58  ;;  %v2333_v4 = vmul.f32 %v3851_v1, %v2301_v8  ;;  %v2334_v7 = vmul.f32 %v3856_v6, %v2306_v63 }
 0x20e   : > { %v2375_v5 = vadd.f32 %v2374_v0, %v2346_v52  ;;  %v2361_v13 = vadd.f32 %v2360_v3, %v2332_v61  ;;  %v2348_v18 = vmul.f32 %v3851_v1, %v2333_v4  ;;  %v2349_v21 = vmul.f32 %v3856_v6, %v2334_v7 }
 0x20f   : > { %v2316_v14 = vpop.permute.xlu1 %2315  ;;  %v2311_v48 = vpop.permute.xlu0 %2310 }
 0x210   : > { %v2376_v16 = vadd.f32 %v2375_v5, %v2347_v44  ;;  %v2362_v22 = vadd.f32 %v2361_v13, %v2333_v4  ;;  %v2335_v23 = vmul.f32 %v3865_v42, %v2311_v48  ;;  %v2336_v26 = vmul.f32 %v3869_v45, %v2316_v14 }
 0x212   : > { %v2377_v24 = vadd.f32 %v2376_v16, %v2348_v18  ;;  %v2363_v32 = vadd.f32 %v2362_v22, %v2334_v7  ;;  %v2350_v28 = vmul.f32 %v3865_v42, %v2335_v23  ;;  %v2351_v1 = vmul.f32 %v3869_v45, %v2336_v26 }
 0x213   : > { %v2321_v10 = vpop.permute.xlu0 %2320 }
 0x214   : > { %v2378_v19 = vadd.f32 %v2377_v24, %v2349_v21  ;;  %v2364_v12 = vadd.f32 %v2363_v32, %v2335_v23  ;;  %v2337_v27 = vmul.f32 %v3863_v39, %v2321_v10 }
 0x216   : > { %v2379_v31 = vadd.f32 %v2378_v19, %v2350_v28  ;;  %v2365_v36 = vadd.f32 %v2364_v12, %v2336_v26  ;;  %v2352_v37 = vmul.f32 %v3863_v39, %v2337_v27 }
 0x218   : > { %v2380_v17 = vadd.f32 %v2379_v31, %v2351_v1  ;;  %v2366_v6 = vadd.f32 %v2365_v36, %v2337_v27 }
 0x21a   : > { %2367 = vst [vmem:[%s3436_s28] sm:$0xff] %v2366_v6  ;;  %v2381_v20 = vadd.f32 %v2380_v17, %v2352_v37 }
 0x21c   : > { %2382 = vst [vmem:[%s3436_s28 + $0x8] sm:$0xff] %v2381_v20 }
 0x21d PF: > { %s15_s21 = sadd.s32 1, %s3349_s21   ;;  %s4002_s24 = sld [smem:[#allocation3_spill]] }
 0x21e   : > { %p12_p11 = scmp.ge.s32.totalorder %s15_s21, 62   ;;  %s4003_s14 = sld [smem:[#allocation4_spill]] }
 0x21f   : > { %s4004_s15 = smov %s3337_s18  ;;  %s4005_s16 = smov %s3341_s19 }
 0x220   : > { %s4006_s17 = smov %s3345_s20  ;;  %s4007_s18 = smov %s4011_s22 }
 0x221   :  { %14 = sbr.rel (!%p12_p11) target bundleno = 4 (0x4), region = 91 }
 0x223   : > { %s4008_s19 = smov %s4002_s24 }
 0x224   : > { %s4009_s20 = smov %s4003_s14 }

// kernel: conv3d_bn_pallas.3
= control target key start
LH: loop header
LB: loop body
LE: loop exit
PB: predicated region body
PF: predicated region fallthrough
CT: control target
= control target key end

     0   :  { %s634_s9 = smov 0   ;;  %s636_s10 = smov 0   ;;  %s698_s0 = inlined_call_operand.vmem [shape: bf16[2,10,120,128], index: 0, kind: input, shape index: {}, may-alias: {0,2}]   ;;  %s699_s1 = inlined_call_operand.vmem [shape: f32[8,128], index: 1, kind: input, shape index: {}]   ;;  %s700_s2 = inlined_call_operand.vmem [shape: bf16[2,10,120,128], index: 2, kind: output, shape index: {}, may-alias: {0,2}]  }
   0x1   :  { %s638_s11 = smov 0   ;;  %s640_s12 = smov 0  }
   0x2   :  { %s642_s13 = smov 0  }
   0x3 LB: > { %s21_s14 = sadd.s32 1, %s609_s11  ;;  %s24_s15 = sadd.s32 1, %s613_s12  ;;  %s617_s13 = sphi %s642_s13, %s12_s13   ;;  %s613_s12 = sphi %s640_s12, %s704_s12   ;;  %s609_s11 = sphi %s638_s11, %s703_s11   ;;  %s605_s10 = sphi %s636_s10, %s702_s10   ;;  %s601_s9 = sphi %s634_s9, %s701_s9  }
   0x4   : > { %p22_p0 = scmp.ge.s32.totalorder %s21_s14, 10  ;;  %p425_p1 = scmp.ge.s32.totalorder %s617_s13, 1 }
   0x5   : > { %p132_p2 = scmp.lt.s32.totalorder %s617_s13, 21 }
   0x6   : > { %s706_s14 = smov (%p22_p0, %s21_s14), 0  ;;  %s708_s15 = smov (!%p22_p0, %s24_s15), %s613_s12 }
   0x7   : > { %p133_p3 = pnand %p425_p1, %p132_p2  ;;  %p26_p4 = scmp.ge.s32.totalorder %s708_s15, 2 }
   0x8   : > { %p162_p5 = scmp.lt.s32.totalorder (!%p133_p3), %s605_s10, 1  ;;  %p164_p6 = scmp.lt.s32.totalorder (!%p133_p3), %s601_s9, 9  ;;  %v428_v0 = vld [vmem:[%s699_s1] ss:$0 sm:$0xff] (!%p133_p3)  ;;  %v429_v29 = vld [vmem:[%s699_s1 + $0x1] ss:$0 sm:$0xff] (!%p133_p3) }
   0x9   : > { %s710_s15 = smov (%p26_p4, %s708_s15), 0  ;;  %136 = sbr.rel (%p133_p3) target bundleno = 41 (0x29), region = 28 }
  0x10   : > { %s712_s10 = smov (!%p162_p5, %s605_s10), 1  ;;  %s714_s9 = smov (!%p164_p6, %s601_s9), 9 }
  0x11   : > { %s538_s16 = smul.u32 150, %s712_s10 }
  0x12   : > { %s537_s17 = smul.u32 15, %s714_s9 }
  0x14   : > { %s664_s18 = sadd.s32 %s538_s16, %s537_s17 }
  0x15   : > { %s426_s19 = sshll.u32 %s664_s18, 2 }
  0x16   : > { %s170_s22 = scalar_lea.vmem %s698_s0, %s426_s19  ;;  %s179_s29 = scalar_lea.vmem %s700_s2, %s426_s19 }
  0x17   : > { %v463_v1 = vld [vmem:[%s170_s22] sm:$0xff]   ;;  %v525_v2 = vld [vmem:[%s170_s22 + $0x8] sm:$0xff]   ;;  %v526_v3 = vld [vmem:[%s170_s22 + $0x10] sm:$0xff]  }
  0x18   : > { %v464_v4 = vunpack.c.l.bf16 %v463_v1  ;;  %v465_v5 = vunpack.c.h.bf16 %v463_v1  ;;  %v468_v6 = vunpack.c.l.bf16 %v525_v2  ;;  %v469_v7 = vunpack.c.h.bf16 %v525_v2  ;;  %v527_v8 = vld [vmem:[%s170_s22 + $0x18] sm:$0xff]   ;;  %v528_v9 = vld [vmem:[%s170_s22 + $0x20] sm:$0xff]   ;;  %v529_v10 = vld [vmem:[%s170_s22 + $0x28] sm:$0xff]  }
  0x19   : > { %v472_v11 = vunpack.c.l.bf16 %v526_v3  ;;  %v473_v12 = vunpack.c.h.bf16 %v526_v3  ;;  %v476_v13 = vunpack.c.l.bf16 %v527_v8  ;;  %v477_v14 = vunpack.c.h.bf16 %v527_v8  ;;  %v530_v15 = vld [vmem:[%s170_s22 + $0x30] sm:$0xff]   ;;  %v194_v16 = vld [vmem:[%s170_s22 + $0x38] sm:$0xf] }
  0x1a   : > { %v480_v17 = vunpack.c.l.bf16 %v528_v9  ;;  %v481_v18 = vunpack.c.h.bf16 %v528_v9  ;;  %v484_v19 = vunpack.c.l.bf16 %v529_v10  ;;  %v485_v20 = vunpack.c.h.bf16 %v529_v10 }
  0x1b   : > { %v488_v21 = vunpack.c.l.bf16 %v530_v15  ;;  %v489_v22 = vunpack.c.h.bf16 %v530_v15  ;;  %v209_v23 = vunpack.c.l.bf16 %v194_v16  ;;  %v215_v24 = vmul.f32 %v464_v4, %v428_v0 }
  0x1c   : > { %v216_v25 = vmul.f32 %v465_v5, %v428_v0  ;;  %v217_v26 = vmul.f32 %v468_v6, %v428_v0  ;;  %v218_v27 = vmul.f32 %v469_v7, %v428_v0  ;;  %v219_v28 = vmul.f32 %v472_v11, %v428_v0 }
  0x1d   : > { %v220_v30 = vmul.f32 %v473_v12, %v428_v0  ;;  %v221_v31 = vmul.f32 %v476_v13, %v428_v0  ;;  %v222_v32 = vmul.f32 %v477_v14, %v428_v0  ;;  %v223_v33 = vmul.f32 %v480_v17, %v428_v0 }
  0x1e   : > { %v224_v34 = vmul.f32 %v481_v18, %v428_v0  ;;  %v225_v35 = vmul.f32 %v484_v19, %v428_v0  ;;  %v226_v36 = vmul.f32 %v485_v20, %v428_v0  ;;  %v227_v37 = vmul.f32 %v488_v21, %v428_v0 }
  0x1f   : > { %v228_v38 = vmul.f32 %v489_v22, %v428_v0  ;;  %v229_v39 = vmul.f32 %v428_v0, %v209_v23  ;;  %v235_v40 = vadd.f32 %v429_v29, %v215_v24  ;;  %v236_v41 = vadd.f32 %v429_v29, %v216_v25 }
  0x20   : > { %v237_v42 = vadd.f32 %v429_v29, %v217_v26  ;;  %v238_v43 = vadd.f32 %v429_v29, %v218_v27  ;;  %v239_v44 = vadd.f32 %v429_v29, %v219_v28  ;;  %v240_v45 = vadd.f32 %v429_v29, %v220_v30 }
  0x21   : > { %v249_v46 = vadd.f32 %v429_v29, %v229_v39  ;;  %v493_v47 = vpack.c.bf16 %v236_v41, %v235_v40  ;;  %v241_v48 = vadd.f32 %v429_v29, %v221_v31  ;;  %v242_v49 = vadd.f32 %v429_v29, %v222_v32 }
  0x22   : > { %v498_v50 = vpack.c.bf16 %v238_v43, %v237_v42  ;;  %v503_v51 = vpack.c.bf16 %v240_v45, %v239_v44  ;;  %v243_v52 = vadd.f32 %v429_v29, %v223_v33  ;;  %v244_v53 = vadd.f32 %v429_v29, %v224_v34 }
  0x23   : > { %v461_v54 = vpack.c.bf16 %v249_v46, %v249_v46  ;;  %494 = vst [vmem:[%s179_s29] sm:$0xff] %v493_v47   ;;  %v508_v55 = vpack.c.bf16 %v242_v49, %v241_v48  ;;  %v245_v56 = vadd.f32 %v429_v29, %v225_v35  ;;  %v246_v57 = vadd.f32 %v429_v29, %v226_v36 }
  0x24   : > { %531 = vst [vmem:[%s179_s29 + $0x8] sm:$0xff] %v498_v50   ;;  %532 = vst [vmem:[%s179_s29 + $0x10] sm:$0xff] %v503_v51   ;;  %v513_v58 = vpack.c.bf16 %v244_v53, %v243_v52  ;;  %v247_v59 = vadd.f32 %v429_v29, %v227_v37  ;;  %v248_v60 = vadd.f32 %v429_v29, %v228_v38 }
  0x25   : > { %325 = vst [vmem:[%s179_s29 + $0x38] sm:$0xf] %v461_v54  ;;  %533 = vst [vmem:[%s179_s29 + $0x18] sm:$0xff] %v508_v55   ;;  %v518_v61 = vpack.c.bf16 %v246_v57, %v245_v56 }
  0x26   : > { %534 = vst [vmem:[%s179_s29 + $0x20] sm:$0xff] %v513_v58   ;;  %v523_v62 = vpack.c.bf16 %v248_v60, %v247_v59 }
  0x27   : > { %535 = vst [vmem:[%s179_s29 + $0x28] sm:$0xff] %v518_v61  }
  0x28   : > { %536 = vst [vmem:[%s179_s29 + $0x30] sm:$0xff] %v523_v62  }
  0x29 PF: > { %s12_s13 = sadd.s32 1, %s617_s13   ;;  %s701_s9 = smov %s609_s11 }
  0x2a   : > { %p9_p7 = scmp.ge.s32.totalorder %s12_s13, 22   ;;  %s702_s10 = smov %s613_s12 }
  0x2b   : > { %s703_s11 = smov %s706_s14  ;;  %s704_s12 = smov %s710_s15 }
  0x2c   :  { %11 = sbr.rel (!%p9_p7) target bundleno = 3 (0x3), region = 58 }

</bundles_post_ra>
